<compile_context>
chip_gen: v7x
topology: tpu7x:2x2x1
jax: 0.10.0
libtpu: 0.0.40
codegen_flags: <defaults>
</compile_context>

<pallas_src>
import math
import functools

import jax
import jax.numpy as jnp
from jax import lax
from jax.experimental import pallas as pl
from jax.experimental.pallas import tpu as pltpu


def bert_attention_kernel(
    x_full_ref,   # (1, S, H)   full sequence (for K/V projection, per batch element)
    x_q_ref,      # (1, TQ, H)  query tile (Q projection + residual)
    mask_ref,     # (1, 1, 1, S) additive attention mask
    wq_ref, bq_ref,   # (H, H) bf16 (pre-transposed, scale folded), (1, H) f32
    wk_ref, bk_ref,
    wv_ref, bv_ref,
    wo_ref, bo_ref,
    gamma_ref, beta_ref,  # (1, H), (1, H) f32 LayerNorm params
    o_ref,        # (1, TQ, H) output tile
    k_scr, v_scr, # (nh, S, d) bf16 VMEM scratch (K/V, head-major, resident per batch)
    *, num_heads, head_dim, eps,
):
    _, S, H = x_full_ref.shape
    TQ = x_q_ref.shape[1]
    qt = pl.program_id(1)

    # ---- K / V projections: once per batch element (query-tile axis is the inner,
    # "arbitrary" grid axis, so scratch persists across qt for a fixed b).
    @pl.when(qt == 0)
    def _():
        xf = x_full_ref[0].astype(jnp.bfloat16)                      # (S, H)
        k = jnp.dot(xf, wk_ref[...], preferred_element_type=jnp.float32) + bk_ref[...]
        v = jnp.dot(xf, wv_ref[...], preferred_element_type=jnp.float32) + bv_ref[...]
        k_scr[...] = jnp.transpose(
            k.reshape(S, num_heads, head_dim), (1, 0, 2)).astype(jnp.bfloat16)
        v_scr[...] = jnp.transpose(
            v.reshape(S, num_heads, head_dim), (1, 0, 2)).astype(jnp.bfloat16)

    x_q = x_q_ref[0]                       # (TQ, H) f32 — residual kept in f32
    mask = mask_ref[0, 0]                  # (1, S) — broadcasts over heads & queries

    # ---- Q projection (1/sqrt(head_dim) already folded into wq/bq).
    q = jnp.dot(x_q.astype(jnp.bfloat16), wq_ref[...],
                preferred_element_type=jnp.float32) + bq_ref[...]    # (TQ, H) f32
    q3 = jnp.transpose(
        q.reshape(TQ, num_heads, head_dim), (1, 0, 2)).astype(jnp.bfloat16)  # (nh,TQ,d)

    # ---- Batched attention over all heads at once (bf16 operands, f32 acc).
    scores = jnp.einsum('nqd,nkd->nqk', q3, k_scr[...],
                        preferred_element_type=jnp.float32)          # (nh, TQ, S)
    scores = scores + mask

    # Softmax in f32 (v5e has no bf16 VPU/EUP path; keeps numerics tight everywhere).
    m = jnp.max(scores, axis=-1, keepdims=True)
    e = jnp.exp(scores - m)
    probs = e * pl.reciprocal(jnp.sum(e, axis=-1, keepdims=True), approx=True)
    # (attention-probs dropout: identity in eval mode)

    ctx = jnp.einsum('nqk,nkd->nqd', probs.astype(jnp.bfloat16), v_scr[...],
                     preferred_element_type=jnp.float32)             # (nh, TQ, d)
    ctx = jnp.transpose(ctx, (1, 0, 2)).reshape(TQ, H)               # concat heads

    # ---- Output dense + residual + LayerNorm (TF-style, eps inside sqrt).
    out = jnp.dot(ctx.astype(jnp.bfloat16), wo_ref[...],
                  preferred_element_type=jnp.float32) + bo_ref[...]
    # (hidden dropout: identity in eval mode)
    h = out + x_q
    u = jnp.mean(h, axis=-1, keepdims=True)
    c = h - u
    s = jnp.mean(c * c, axis=-1, keepdims=True)
    y = gamma_ref[...] * (c * lax.rsqrt(s + eps)) + beta_ref[...]

    o_ref[0] = y.astype(o_ref.dtype)


def prepare_params(params, *, num_heads):
    """One-time parameter prep (outside the hot path): transpose nn.Linear weights
    to (in, out), fold 1/sqrt(head_dim) into Q, and store weights in bf16 for the
    MXU / halved VMEM residency.  Biases & LN params stay f32."""
    H = params["wq"].shape[0]
    head_dim = H // num_heads
    scale = 1.0 / math.sqrt(head_dim)
    return {
        "wq": (params["wq"].T * scale).astype(jnp.bfloat16),
        "bq": (params["bq"] * scale).reshape(1, H).astype(jnp.float32),
        "wk": params["wk"].T.astype(jnp.bfloat16),
        "bk": params["bk"].reshape(1, H).astype(jnp.float32),
        "wv": params["wv"].T.astype(jnp.bfloat16),
        "bv": params["bv"].reshape(1, H).astype(jnp.float32),
        "wo": params["wo"].T.astype(jnp.bfloat16),
        "bo": params["bo"].reshape(1, H).astype(jnp.float32),
        "gamma": params["gamma"].reshape(1, H).astype(jnp.float32),
        "beta": params["beta"].reshape(1, H).astype(jnp.float32),
    }


def _vmem_limit_bytes():
    """Per-generation VMEM budget with headroom under physical capacity:
    ~48 MiB on v7x (64 MiB physical), 96 MiB on v5e/v6e (128 MiB physical)."""
    try:
        phys = pltpu.get_tpu_info().vmem_capacity_bytes
    except Exception:
        phys = 64 << 20  # conservative (v7x) fallback
    return int(min(phys * 3 // 4, 96 << 20))


def _choose_q_tile(S, num_heads, score_budget_bytes=20 << 20):
    """Largest query tile keeping ~3 f32 (nh, TQ, S) softmax intermediates under
    budget.  Result is either S itself or a multiple of 8 dividing S."""
    tq = S
    while tq > 128 and tq % 16 == 0 and 3 * num_heads * tq * S * 4 > score_budget_bytes:
        tq //= 2
    return tq


def bert_attention(x, attention_mask, prepped, *, num_heads, eps=1e-12, q_tile=None):
    """x: (B, S, H) fp32; attention_mask: (B, 1, 1, S) fp32 additive mask.
    `prepped` comes from prepare_params (weights transposed/scaled, bf16)."""
    B, S, H = x.shape
    head_dim = H // num_heads
    TQ = q_tile if q_tile is not None else _choose_q_tile(S, num_heads)
    assert S % TQ == 0 and (TQ == S or TQ % 8 == 0), (S, TQ)
    nq = S // TQ

    # Weights / biases / LN params: whole array resident in VMEM, single-buffered
    # (constant across the grid -> no per-step DMA, no redundant double buffers).
    vmem_whole = pl.BlockSpec(memory_space=pltpu.MemorySpace.VMEM)

    kernel = functools.partial(
        bert_attention_kernel, num_heads=num_heads, head_dim=head_dim, eps=eps
    )

    return pl.pallas_call(
        kernel,
        out_shape=jax.ShapeDtypeStruct((B, S, H), x.dtype),
        grid_spec=pltpu.PrefetchScalarGridSpec(
            num_scalar_prefetch=0,
            grid=(B, nq),
            in_specs=[
                pl.BlockSpec((1, S, H), lambda b, q: (b, 0, 0)),         # x (full seq)
                pl.BlockSpec((1, TQ, H), lambda b, q: (b, q, 0)),        # x (query tile)
                pl.BlockSpec((1, 1, 1, S), lambda b, q: (b, 0, 0, 0)),   # mask
                vmem_whole, vmem_whole,   # wq, bq
                vmem_whole, vmem_whole,   # wk, bk
                vmem_whole, vmem_whole,   # wv, bv
                vmem_whole, vmem_whole,   # wo, bo
                vmem_whole, vmem_whole,   # gamma, beta
            ],
            out_specs=pl.BlockSpec((1, TQ, H), lambda b, q: (b, q, 0)),
            scratch_shapes=[
                pltpu.VMEM((num_heads, S, head_dim), jnp.bfloat16),   # K (head-major)
                pltpu.VMEM((num_heads, S, head_dim), jnp.bfloat16),   # V (head-major)
            ],
        ),
        compiler_params=pltpu.CompilerParams(
            # Batch axis parallel (megacore); query-tile axis arbitrary so the K/V
            # scratch computed at qt==0 is reused across tiles of the same b.
            dimension_semantics=("parallel", "arbitrary"),
            vmem_limit_bytes=_vmem_limit_bytes(),
        ),
    )(
        x, x, attention_mask,
        prepped["wq"], prepped["bq"],
        prepped["wk"], prepped["bk"],
        prepped["wv"], prepped["bv"],
        prepped["wo"], prepped["bo"],
        prepped["gamma"], prepped["beta"],
    )


def init_params(key, hidden_size):
    """Deterministic synthetic parameter init (torch nn.Linear shapes: (out, in))."""
    keys = jax.random.split(key, 8)
    std = 0.02
    H = hidden_size
    return {
        "wq": jax.random.normal(keys[0], (H, H), jnp.float32) * std,
        "bq": jax.random.normal(keys[1], (H,), jnp.float32) * std,
        "wk": jax.random.normal(keys[2], (H, H), jnp.float32) * std,
        "bk": jax.random.normal(keys[3], (H,), jnp.float32) * std,
        "wv": jax.random.normal(keys[4], (H, H), jnp.float32) * std,
        "bv": jax.random.normal(keys[5], (H,), jnp.float32) * std,
        "wo": jax.random.normal(keys[6], (H, H), jnp.float32) * std,
        "bo": jax.random.normal(keys[7], (H,), jnp.float32) * std,
        "gamma": jnp.ones((H,), jnp.float32),
        "beta": jnp.zeros((H,), jnp.float32),
    }


def bert_attention_ref(x, attention_mask, params, *, num_heads, eps=1e-12):
    """Pure-JAX f32 reference mirroring the PyTorch forward (eval mode)."""
    B, S, H = x.shape
    d = H // num_heads

    def linear(v, w, b):
        return jnp.einsum("bsh,oh->bso", v, w) + b

    q = linear(x, params["wq"], params["bq"]).reshape(B, S, num_heads, d).transpose(0, 2, 1, 3)
    k = linear(x, params["wk"], params["bk"]).reshape(B, S, num_heads, d).transpose(0, 2, 1, 3)
    v = linear(x, params["wv"], params["bv"]).reshape(B, S, num_heads, d).transpose(0, 2, 1, 3)

    scores = jnp.einsum("bhqd,bhkd->bhqk", q, k) / math.sqrt(d)
    scores = scores + attention_mask
    probs = jax.nn.softmax(scores, axis=-1)
    ctx = jnp.einsum("bhqk,bhkd->bhqd", probs, v).transpose(0, 2, 1, 3).reshape(B, S, H)

    out = jnp.einsum("bsh,oh->bso", ctx, params["wo"]) + params["bo"]
    h = out + x
    u = h.mean(-1, keepdims=True)
    s = ((h - u) ** 2).mean(-1, keepdims=True)
    return params["gamma"] * ((h - u) / jnp.sqrt(s + eps)) + params["beta"]


if __name__ == "__main__":
    # Small correctness-check shapes.  For performance work, benchmark at realistic
    # BERT shapes instead (e.g. B=8, S=512, H=768, num_heads=12): the toy config
    # never exercises the MXU / DMA pipeline / VMEM budget.
    B, S, H, NUM_HEADS = 2, 8, 32, 4

    key = jax.random.PRNGKey(0)
    k_x, k_mask, k_params = jax.random.split(key, 3)

    x = jax.random.normal(k_x, (B, S, H), jnp.float32)
    # Additive attention mask (0 for visible, -10000 for masked), BERT style.
    keep = jax.random.bernoulli(k_mask, p=0.9, shape=(B, 1, 1, S))
    attention_mask = jnp.where(keep, 0.0, -10000.0).astype(jnp.float32)

    params = init_params(k_params, H)
    prepped = prepare_params(params, num_heads=NUM_HEADS)

    out = bert_attention(x, attention_mask, prepped, num_heads=NUM_HEADS)
    out = jax.block_until_ready(out)

    ref = bert_attention_ref(x, attention_mask, params, num_heads=NUM_HEADS)
    assert out.shape == (B, S, H)
    # Tolerance loosened for the bf16-matmul + approx-reciprocal fast path.
    err = jnp.max(jnp.abs(out - ref))
    assert jnp.allclose(out, ref, atol=2e-2, rtol=2e-2), f"max abs err {err}"

    print("KERNEL_OK")
</pallas_src>

<mosaic_0001>
module attributes {stable_mosaic.version = 11 : i64} {
  func.func @bert_attention_kernel(%arg0: i32, %arg1: i32, %arg2: memref<1x8x32xf32, #tpu.memory_space<vmem>>, %arg3: memref<1x8x32xf32, #tpu.memory_space<vmem>>, %arg4: memref<1x1x1x8xf32, #tpu.memory_space<vmem>>, %arg5: memref<32x32xbf16, #tpu.memory_space<vmem>>, %arg6: memref<1x32xf32, #tpu.memory_space<vmem>>, %arg7: memref<32x32xbf16, #tpu.memory_space<vmem>>, %arg8: memref<1x32xf32, #tpu.memory_space<vmem>>, %arg9: memref<32x32xbf16, #tpu.memory_space<vmem>>, %arg10: memref<1x32xf32, #tpu.memory_space<vmem>>, %arg11: memref<32x32xbf16, #tpu.memory_space<vmem>>, %arg12: memref<1x32xf32, #tpu.memory_space<vmem>>, %arg13: memref<1x32xf32, #tpu.memory_space<vmem>>, %arg14: memref<1x32xf32, #tpu.memory_space<vmem>>, %arg15: memref<1x8x32xf32, #tpu.memory_space<vmem>>, %arg16: memref<4x8x8xbf16, #tpu.memory_space<vmem>>, %arg17: memref<4x8x8xbf16, #tpu.memory_space<vmem>>) attributes {dimension_semantics = [#tpu.dimension_semantics<parallel>, #tpu.dimension_semantics<arbitrary>], iteration_bounds = array<i64: 2, 1>, scalar_prefetch = 0 : i64, scratch_operands = 2 : i64, tpu.core_type = #tpu.core_type<tc>, window_params = [{transform_indices = @transform_0, window_bounds = array<i64: 1, 8, 32>}, {transform_indices = @transform_1, window_bounds = array<i64: 1, 8, 32>}, {transform_indices = @transform_2, window_bounds = array<i64: 1, 1, 1, 8>}, {pipeline_mode = #tpu.pipeline_mode<synchronous>, transform_indices = @transform_3, window_bounds = array<i64: 32, 32>}, {pipeline_mode = #tpu.pipeline_mode<synchronous>, transform_indices = @transform_4, window_bounds = array<i64: 1, 32>}, {pipeline_mode = #tpu.pipeline_mode<synchronous>, transform_indices = @transform_5, window_bounds = array<i64: 32, 32>}, {pipeline_mode = #tpu.pipeline_mode<synchronous>, transform_indices = @transform_6, window_bounds = array<i64: 1, 32>}, {pipeline_mode = #tpu.pipeline_mode<synchronous>, transform_indices = @transform_7, window_bounds = array<i64: 32, 32>}, {pipeline_mode = #tpu.pipeline_mode<synchronous>, transform_indices = @transform_8, window_bounds = array<i64: 1, 32>}, {pipeline_mode = #tpu.pipeline_mode<synchronous>, transform_indices = @transform_9, window_bounds = array<i64: 32, 32>}, {pipeline_mode = #tpu.pipeline_mode<synchronous>, transform_indices = @transform_10, window_bounds = array<i64: 1, 32>}, {pipeline_mode = #tpu.pipeline_mode<synchronous>, transform_indices = @transform_11, window_bounds = array<i64: 1, 32>}, {pipeline_mode = #tpu.pipeline_mode<synchronous>, transform_indices = @transform_12, window_bounds = array<i64: 1, 32>}, {transform_indices = @transform_13, window_bounds = array<i64: 1, 8, 32>}]} {
    %c0_i32 = arith.constant 0 : i32
    %0 = arith.cmpi eq, %arg1, %c0_i32 : i32
    %1 = arith.extui %0 : i1 to i32
    %c0_i32_0 = arith.constant 0 : i32
    %2 = arith.cmpi ne, %1, %c0_i32_0 : i32
    scf.if %2 {
      %c0_38 = arith.constant 0 : index
      %c0_39 = arith.constant 0 : index
      %c0_40 = arith.constant 0 : index
      %68 = vector.load %arg2[%c0_38, %c0_39, %c0_40] : memref<1x8x32xf32, #tpu.memory_space<vmem>>, vector<1x8x32xf32>
      %69 = vector.shape_cast %68 : vector<1x8x32xf32> to vector<8x32xf32>
      %70 = arith.truncf %69 : vector<8x32xf32> to vector<8x32xbf16>
      %c0_41 = arith.constant 0 : index
      %c0_42 = arith.constant 0 : index
      %71 = vector.load %arg7[%c0_41, %c0_42] : memref<32x32xbf16, #tpu.memory_space<vmem>>, vector<32x32xbf16>
      %cst_43 = arith.constant dense<0.000000e+00> : vector<8x32xf32>
      %72 = tpu.matmul %70, %71, %cst_43 {dimension_numbers = #tpu.dot_dimension_numbers<[1], [0], [0], [1], [0, 0, 1, 1], [], []>} : vector<8x32xbf16>, vector<32x32xbf16>, vector<8x32xf32> -> vector<8x32xf32>
      %c0_44 = arith.constant 0 : index
      %c0_45 = arith.constant 0 : index
      %73 = vector.load %arg8[%c0_44, %c0_45] : memref<1x32xf32, #tpu.memory_space<vmem>>, vector<1x32xf32>
      %74 = vector.broadcast %73 : vector<1x32xf32> to vector<8x32xf32>
      %75 = arith.addf %72, %74 : vector<8x32xf32>
      %c0_46 = arith.constant 0 : index
      %c0_47 = arith.constant 0 : index
      %76 = vector.load %arg9[%c0_46, %c0_47] : memref<32x32xbf16, #tpu.memory_space<vmem>>, vector<32x32xbf16>
      %cst_48 = arith.constant dense<0.000000e+00> : vector<8x32xf32>
      %77 = tpu.matmul %70, %76, %cst_48 {dimension_numbers = #tpu.dot_dimension_numbers<[1], [0], [0], [1], [0, 0, 1, 1], [], []>} : vector<8x32xbf16>, vector<32x32xbf16>, vector<8x32xf32> -> vector<8x32xf32>
      %c0_49 = arith.constant 0 : index
      %c0_50 = arith.constant 0 : index
      %78 = vector.load %arg10[%c0_49, %c0_50] : memref<1x32xf32, #tpu.memory_space<vmem>>, vector<1x32xf32>
      %79 = vector.broadcast %78 : vector<1x32xf32> to vector<8x32xf32>
      %80 = arith.addf %77, %79 : vector<8x32xf32>
      %81 = vector.shape_cast %75 : vector<8x32xf32> to vector<8x4x8xf32>
      %82 = tpu.transpose %81, [1, 0, 2] : vector<8x4x8xf32> -> vector<4x8x8xf32>
      %83 = arith.truncf %82 : vector<4x8x8xf32> to vector<4x8x8xbf16>
      %c0_51 = arith.constant 0 : index
      %c0_52 = arith.constant 0 : index
      %c0_53 = arith.constant 0 : index
      %84 = vector.load %arg16[%c0_51, %c0_52, %c0_53] : memref<4x8x8xbf16, #tpu.memory_space<vmem>>, vector<4x8x8xbf16>
      tpu.vector_store %arg16[%c0_51, %c0_52, %c0_53], %83 {strides = array<i32>} : memref<4x8x8xbf16, #tpu.memory_space<vmem>>, vector<4x8x8xbf16>,
      %85 = vector.shape_cast %80 : vector<8x32xf32> to vector<8x4x8xf32>
      %86 = tpu.transpose %85, [1, 0, 2] : vector<8x4x8xf32> -> vector<4x8x8xf32>
      %87 = arith.truncf %86 : vector<4x8x8xf32> to vector<4x8x8xbf16>
      %c0_54 = arith.constant 0 : index
      %c0_55 = arith.constant 0 : index
      %c0_56 = arith.constant 0 : index
      %88 = vector.load %arg17[%c0_54, %c0_55, %c0_56] : memref<4x8x8xbf16, #tpu.memory_space<vmem>>, vector<4x8x8xbf16>
      tpu.vector_store %arg17[%c0_54, %c0_55, %c0_56], %87 {strides = array<i32>} : memref<4x8x8xbf16, #tpu.memory_space<vmem>>, vector<4x8x8xbf16>,
    } else {
    }
    %c0 = arith.constant 0 : index
    %c0_1 = arith.constant 0 : index
    %c0_2 = arith.constant 0 : index
    %3 = vector.load %arg3[%c0, %c0_1, %c0_2] : memref<1x8x32xf32, #tpu.memory_space<vmem>>, vector<1x8x32xf32>
    %4 = vector.shape_cast %3 : vector<1x8x32xf32> to vector<8x32xf32>
    %c0_3 = arith.constant 0 : index
    %c0_4 = arith.constant 0 : index
    %c0_5 = arith.constant 0 : index
    %c0_6 = arith.constant 0 : index
    %5 = vector.load %arg4[%c0_3, %c0_4, %c0_5, %c0_6] : memref<1x1x1x8xf32, #tpu.memory_space<vmem>>, vector<1x1x1x8xf32>
    %6 = vector.shape_cast %5 : vector<1x1x1x8xf32> to vector<1x8xf32>
    %7 = arith.truncf %4 : vector<8x32xf32> to vector<8x32xbf16>
    %c0_7 = arith.constant 0 : index
    %c0_8 = arith.constant 0 : index
    %8 = vector.load %arg5[%c0_7, %c0_8] : memref<32x32xbf16, #tpu.memory_space<vmem>>, vector<32x32xbf16>
    %cst = arith.constant dense<0.000000e+00> : vector<8x32xf32>
    %9 = tpu.matmul %7, %8, %cst {dimension_numbers = #tpu.dot_dimension_numbers<[1], [0], [0], [1], [0, 0, 1, 1], [], []>} : vector<8x32xbf16>, vector<32x32xbf16>, vector<8x32xf32> -> vector<8x32xf32>
    %c0_9 = arith.constant 0 : index
    %c0_10 = arith.constant 0 : index
    %10 = vector.load %arg6[%c0_9, %c0_10] : memref<1x32xf32, #tpu.memory_space<vmem>>, vector<1x32xf32>
    %11 = vector.broadcast %10 : vector<1x32xf32> to vector<8x32xf32>
    %12 = arith.addf %9, %11 : vector<8x32xf32>
    %13 = vector.shape_cast %12 : vector<8x32xf32> to vector<8x4x8xf32>
    %14 = tpu.transpose %13, [1, 0, 2] : vector<8x4x8xf32> -> vector<4x8x8xf32>
    %15 = arith.truncf %14 : vector<4x8x8xf32> to vector<4x8x8xbf16>
    %c0_11 = arith.constant 0 : index
    %c0_12 = arith.constant 0 : index
    %c0_13 = arith.constant 0 : index
    %16 = vector.load %arg16[%c0_11, %c0_12, %c0_13] : memref<4x8x8xbf16, #tpu.memory_space<vmem>>, vector<4x8x8xbf16>
    "tpu.trace_start"() <{level = 10 : i32, message = "nqd,nkd->nqk"}> : () -> ()
    %cst_14 = arith.constant dense<0.000000e+00> : vector<4x8x8xf32>
    %17 = tpu.matmul %15, %16, %cst_14 {dimension_numbers = #tpu.dot_dimension_numbers<[2], [2], [1], [1], [0, 0, 0, 1, 1, 1], [0], [0]>} : vector<4x8x8xbf16>, vector<4x8x8xbf16>, vector<4x8x8xf32> -> vector<4x8x8xf32>
    "tpu.trace_stop"() : () -> ()
    %18 = vector.shape_cast %6 : vector<1x8xf32> to vector<1x1x8xf32>
    %19 = vector.broadcast %18 : vector<1x1x8xf32> to vector<4x8x8xf32>
    %20 = arith.addf %17, %19 : vector<4x8x8xf32>
    %cst_15 = arith.constant dense<0xFF800000> : vector<4x8xf32>
    %21 = vector.multi_reduction <maximumf>, %20, %cst_15 [2] : vector<4x8x8xf32> to vector<4x8xf32>
    %22 = vector.shape_cast %21 : vector<4x8xf32> to vector<4x8x1xf32>
    %23 = vector.broadcast %22 : vector<4x8x1xf32> to vector<4x8x8xf32>
    %24 = arith.subf %20, %23 : vector<4x8x8xf32>
    %25 = math.exp %24 : vector<4x8x8xf32>
    %cst_16 = arith.constant dense<0.000000e+00> : vector<4x8xf32>
    %26 = vector.multi_reduction <add>, %25, %cst_16 [2] : vector<4x8x8xf32> to vector<4x8xf32>
    %27 = vector.shape_cast %26 : vector<4x8xf32> to vector<4x8x1xf32>
    %28 = tpu.reciprocal %27 {approx = true} : vector<4x8x1xf32> -> vector<4x8x1xf32>
    %29 = vector.broadcast %28 : vector<4x8x1xf32> to vector<4x8x8xf32>
    %30 = arith.mulf %25, %29 : vector<4x8x8xf32>
    %31 = arith.truncf %30 : vector<4x8x8xf32> to vector<4x8x8xbf16>
    %c0_17 = arith.constant 0 : index
    %c0_18 = arith.constant 0 : index
    %c0_19 = arith.constant 0 : index
    %32 = vector.load %arg17[%c0_17, %c0_18, %c0_19] : memref<4x8x8xbf16, #tpu.memory_space<vmem>>, vector<4x8x8xbf16>
    "tpu.trace_start"() <{level = 10 : i32, message = "nqk,nkd->nqd"}> : () -> ()
    %cst_20 = arith.constant dense<0.000000e+00> : vector<4x8x8xf32>
    %33 = tpu.matmul %31, %32, %cst_20 {dimension_numbers = #tpu.dot_dimension_numbers<[2], [1], [1], [2], [0, 0, 0, 1, 1, 2], [0], [0]>} : vector<4x8x8xbf16>, vector<4x8x8xbf16>, vector<4x8x8xf32> -> vector<4x8x8xf32>
    "tpu.trace_stop"() : () -> ()
    %34 = tpu.transpose %33, [1, 0, 2] : vector<4x8x8xf32> -> vector<8x4x8xf32>
    %35 = vector.shape_cast %34 : vector<8x4x8xf32> to vector<8x32xf32>
    %36 = arith.truncf %35 : vector<8x32xf32> to vector<8x32xbf16>
    %c0_21 = arith.constant 0 : index
    %c0_22 = arith.constant 0 : index
    %37 = vector.load %arg11[%c0_21, %c0_22] : memref<32x32xbf16, #tpu.memory_space<vmem>>, vector<32x32xbf16>
    %cst_23 = arith.constant dense<0.000000e+00> : vector<8x32xf32>
    %38 = tpu.matmul %36, %37, %cst_23 {dimension_numbers = #tpu.dot_dimension_numbers<[1], [0], [0], [1], [0, 0, 1, 1], [], []>} : vector<8x32xbf16>, vector<32x32xbf16>, vector<8x32xf32> -> vector<8x32xf32>
    %c0_24 = arith.constant 0 : index
    %c0_25 = arith.constant 0 : index
    %39 = vector.load %arg12[%c0_24, %c0_25] : memref<1x32xf32, #tpu.memory_space<vmem>>, vector<1x32xf32>
    %40 = vector.broadcast %39 : vector<1x32xf32> to vector<8x32xf32>
    %41 = arith.addf %38, %40 : vector<8x32xf32>
    %42 = arith.addf %41, %4 : vector<8x32xf32>
    %cst_26 = arith.constant dense<0.000000e+00> : vector<8xf32>
    %43 = vector.multi_reduction <add>, %42, %cst_26 [1] : vector<8x32xf32> to vector<8xf32>
    %44 = vector.shape_cast %43 : vector<8xf32> to vector<8x1xf32>
    %cst_27 = arith.constant 3.200000e+01 : f32
    %45 = vector.broadcast %cst_27 : f32 to vector<8x1xf32>
    %46 = arith.divf %44, %45 : vector<8x1xf32>
    %47 = vector.broadcast %46 : vector<8x1xf32> to vector<8x32xf32>
    %48 = arith.subf %42, %47 : vector<8x32xf32>
    %49 = arith.mulf %48, %48 : vector<8x32xf32>
    %cst_28 = arith.constant dense<0.000000e+00> : vector<8xf32>
    %50 = vector.multi_reduction <add>, %49, %cst_28 [1] : vector<8x32xf32> to vector<8xf32>
    %51 = vector.shape_cast %50 : vector<8xf32> to vector<8x1xf32>
    %cst_29 = arith.constant 3.200000e+01 : f32
    %52 = vector.broadcast %cst_29 : f32 to vector<8x1xf32>
    %53 = arith.divf %51, %52 : vector<8x1xf32>
    %c0_30 = arith.constant 0 : index
    %c0_31 = arith.constant 0 : index
    %54 = vector.load %arg13[%c0_30, %c0_31] : memref<1x32xf32, #tpu.memory_space<vmem>>, vector<1x32xf32>
    %cst_32 = arith.constant 9.99999996E-13 : f32
    %55 = vector.broadcast %cst_32 : f32 to vector<8x1xf32>
    %56 = arith.addf %53, %55 : vector<8x1xf32>
    %57 = math.rsqrt %56 : vector<8x1xf32>
    %58 = vector.broadcast %57 : vector<8x1xf32> to vector<8x32xf32>
    %59 = arith.mulf %48, %58 : vector<8x32xf32>
    %60 = vector.broadcast %54 : vector<1x32xf32> to vector<8x32xf32>
    %61 = arith.mulf %60, %59 : vector<8x32xf32>
    %c0_33 = arith.constant 0 : index
    %c0_34 = arith.constant 0 : index
    %62 = vector.load %arg14[%c0_33, %c0_34] : memref<1x32xf32, #tpu.memory_space<vmem>>, vector<1x32xf32>
    %63 = vector.broadcast %62 : vector<1x32xf32> to vector<8x32xf32>
    %64 = arith.addf %61, %63 : vector<8x32xf32>
    %c0_35 = arith.constant 0 : index
    %c0_36 = arith.constant 0 : index
    %c0_37 = arith.constant 0 : index
    %65 = vector.load %arg15[%c0_35, %c0_36, %c0_37] : memref<1x8x32xf32, #tpu.memory_space<vmem>>, vector<1x8x32xf32>
    %66 = vector.shape_cast %65 : vector<1x8x32xf32> to vector<8x32xf32>
    %67 = vector.shape_cast %64 : vector<8x32xf32> to vector<1x8x32xf32>
    tpu.vector_store %arg15[%c0_35, %c0_36, %c0_37], %67 {strides = array<i32>} : memref<1x8x32xf32, #tpu.memory_space<vmem>>, vector<1x8x32xf32>,
    return
  }
  func.func @transform_0(%arg0: i32, %arg1: i32) -> (i32, i32, i32) {
    %c0_i32 = arith.constant 0 : i32
    %c0_i32_0 = arith.constant 0 : i32
    %c0_i32_1 = arith.constant 0 : i32
    return %arg0, %c0_i32, %c0_i32_0 : i32, i32, i32
  }
  func.func @transform_1(%arg0: i32, %arg1: i32) -> (i32, i32, i32) {
    %c0_i32 = arith.constant 0 : i32
    %c0_i32_0 = arith.constant 0 : i32
    return %arg0, %arg1, %c0_i32 : i32, i32, i32
  }
  func.func @transform_2(%arg0: i32, %arg1: i32) -> (i32, i32, i32, i32) {
    %c0_i32 = arith.constant 0 : i32
    %c0_i32_0 = arith.constant 0 : i32
    %c0_i32_1 = arith.constant 0 : i32
    %c0_i32_2 = arith.constant 0 : i32
    return %arg0, %c0_i32, %c0_i32_0, %c0_i32_1 : i32, i32, i32, i32
  }
  func.func @transform_3(%arg0: i32, %arg1: i32) -> (i32, i32) {
    %c0_i32 = arith.constant 0 : i32
    %c0_i32_0 = arith.constant 0 : i32
    %c0_i32_1 = arith.constant 0 : i32
    return %c0_i32, %c0_i32_0 : i32, i32
  }
  func.func @transform_4(%arg0: i32, %arg1: i32) -> (i32, i32) {
    %c0_i32 = arith.constant 0 : i32
    %c0_i32_0 = arith.constant 0 : i32
    %c0_i32_1 = arith.constant 0 : i32
    return %c0_i32, %c0_i32_0 : i32, i32
  }
  func.func @transform_5(%arg0: i32, %arg1: i32) -> (i32, i32) {
    %c0_i32 = arith.constant 0 : i32
    %c0_i32_0 = arith.constant 0 : i32
    %c0_i32_1 = arith.constant 0 : i32
    return %c0_i32, %c0_i32_0 : i32, i32
  }
  func.func @transform_6(%arg0: i32, %arg1: i32) -> (i32, i32) {
    %c0_i32 = arith.constant 0 : i32
    %c0_i32_0 = arith.constant 0 : i32
    %c0_i32_1 = arith.constant 0 : i32
    return %c0_i32, %c0_i32_0 : i32, i32
  }
  func.func @transform_7(%arg0: i32, %arg1: i32) -> (i32, i32) {
    %c0_i32 = arith.constant 0 : i32
    %c0_i32_0 = arith.constant 0 : i32
    %c0_i32_1 = arith.constant 0 : i32
    return %c0_i32, %c0_i32_0 : i32, i32
  }
  func.func @transform_8(%arg0: i32, %arg1: i32) -> (i32, i32) {
    %c0_i32 = arith.constant 0 : i32
    %c0_i32_0 = arith.constant 0 : i32
    %c0_i32_1 = arith.constant 0 : i32
    return %c0_i32, %c0_i32_0 : i32, i32
  }
  func.func @transform_9(%arg0: i32, %arg1: i32) -> (i32, i32) {
    %c0_i32 = arith.constant 0 : i32
    %c0_i32_0 = arith.constant 0 : i32
    %c0_i32_1 = arith.constant 0 : i32
    return %c0_i32, %c0_i32_0 : i32, i32
  }
  func.func @transform_10(%arg0: i32, %arg1: i32) -> (i32, i32) {
    %c0_i32 = arith.constant 0 : i32
    %c0_i32_0 = arith.constant 0 : i32
    %c0_i32_1 = arith.constant 0 : i32
    return %c0_i32, %c0_i32_0 : i32, i32
  }
  func.func @transform_11(%arg0: i32, %arg1: i32) -> (i32, i32) {
    %c0_i32 = arith.constant 0 : i32
    %c0_i32_0 = arith.constant 0 : i32
    %c0_i32_1 = arith.constant 0 : i32
    return %c0_i32, %c0_i32_0 : i32, i32
  }
  func.func @transform_12(%arg0: i32, %arg1: i32) -> (i32, i32) {
    %c0_i32 = arith.constant 0 : i32
    %c0_i32_0 = arith.constant 0 : i32
    %c0_i32_1 = arith.constant 0 : i32
    return %c0_i32, %c0_i32_0 : i32, i32
  }
  func.func @transform_13(%arg0: i32, %arg1: i32) -> (i32, i32, i32) {
    %c0_i32 = arith.constant 0 : i32
    %c0_i32_0 = arith.constant 0 : i32
    return %arg0, %arg1, %c0_i32 : i32, i32, i32
  }
}

</mosaic_0001>

<bundles_post_ra>
// kernel: tpu_custom_call.1
= control target key start
LH: loop header
LB: loop body
LE: loop exit
PB: predicated region body
PF: predicated region fallthrough
CT: control target
= control target key end

     0   :  { %s3394_s0 = inlined_call_operand.hbm [shape: f32[2,8,32], index: 0, kind: input, shape index: {}]   ;;  %s3395_s1 = inlined_call_operand.hbm [shape: f32[2,8,32], index: 1, kind: input, shape index: {}]   ;;  %s3396_s2 = inlined_call_operand.vmem [shape: f32[2,1,1,8], index: 2, kind: input, shape index: {}]   ;;  %s3397_s3 = inlined_call_operand.hbm [shape: bf16[32,32], index: 3, kind: input, shape index: {}]   ;;  %s3398_s4 = inlined_call_operand.hbm [shape: f32[1,32], index: 4, kind: input, shape index: {}]   ;;  %s3399_s5 = inlined_call_operand.vmem [shape: bf16[32,32], index: 5, kind: input, shape index: {}]   ;;  %s3400_s6 = inlined_call_operand.hbm [shape: f32[1,32], index: 6, kind: input, shape index: {}]   ;;  %s3401_s7 = inlined_call_operand.hbm [shape: bf16[32,32], index: 7, kind: input, shape index: {}]   ;;  %s3402_s8 = inlined_call_operand.hbm [shape: f32[1,32], index: 8, kind: input, shape index: {}]   ;;  %s3403_s9 = inlined_call_operand.vmem [shape: bf16[32,32], index: 9, kind: input, shape index: {}]   ;;  %s3404_s10 = inlined_call_operand.vmem [shape: f32[1,32], index: 10, kind: input, shape index: {}]   ;;  %s3405_s11 = inlined_call_operand.vmem [shape: f32[1,32], index: 11, kind: input, shape index: {}]   ;;  %s3406_s12 = inlined_call_operand.vmem [shape: f32[1,32], index: 12, kind: input, shape index: {}]   ;;  %s3407_s13 = inlined_call_operand.hbm [shape: f32[2,8,32], index: 13, kind: output, shape index: {}]  }
   0x1   :  { %3415 = sst [smem:[#allocation24_spill]] %s3396_s2 }
   0x2   :  { %3416 = sst [smem:[#allocation25_spill]] %s3397_s3 }
   0x3   :  { %3417 = sst [smem:[#allocation26_spill]] %s3398_s4 }
   0x4   :  { %3418 = sst [smem:[#allocation27_spill]] %s3400_s6 }
   0x5   :  { %3419 = sst [smem:[#allocation28_spill]] %s3401_s7 }
   0x6   :  { %3420 = sst [smem:[#allocation29_spill]] %s3402_s8 }
   0x7   :  { %3421 = sst [smem:[#allocation30_spill]] %s3403_s9 }
   0x8   :  { %3422 = sst [smem:[#allocation31_spill]] %s3404_s10 }
   0x9   :  { %3423 = sst [smem:[#allocation32_spill]] %s3405_s11 }
   0xa   :  { %3424 = sst [smem:[#allocation33_spill]] %s3406_s12 }
   0xb   :  { %3425 = sst [smem:[#allocation34_spill]] %s3407_s13 }
   0xc   :  { %18 = vsyncpa [#allocation5], 0 }
   0xd   :  { %20 = vsyncpa [#allocation5 + $0x1], 0 }
   0xe   :  { %21 = vsyncpa [#allocation8], 0 }
   0xf   :  { %23 = vsyncpa [#allocation8 + $0x1], 0 }
  0x10   :  { %24 = vsyncpa [#allocation11], 0 }
  0x11   :  { %25 = vsyncpa [#allocation14], 0 }
  0x12   :  { %26 = vsyncpa [#allocation6], 0 }
  0x13   :  { %28 = vsyncpa [#allocation6 + $0x1], 0  ;;  %s2829_s25 = smov 0   ;;  %s2831_s26 = smov 0  }
  0x14   :  { %s2833_s27 = smov 0   ;;  %s2835_s28 = smov 0  }
  0x15   :  { %s2837_s29 = smov 0   ;;  %s2839_s30 = smov 0  }
  0x16 LB: > { %3426 = sst [smem:[#allocation23_spill]] %s2729_s28  ;;  %s2860_s14 = sadd.s32 4294967295, %s2737_s30   ;;  %s2737_s30 = sphi %s2839_s30, %s34_s30   ;;  %s2733_s29 = sphi %s2837_s29, %s3463_s29   ;;  %s2729_s28 = sphi %s2835_s28, %s3462_s28   ;;  %s2725_s27 = sphi %s2833_s27, %s3461_s27   ;;  %s2721_s26 = sphi %s2831_s26, %s3460_s26   ;;  %s2717_s25 = sphi %s2829_s25, %s3459_s25  }
  0x17   : > { %p2116_p0 = scmp.ge.s32.totalorder %s2737_s30, 1  ;;  %p3411_p1 = scmp.eq.s32.totalorder %s2860_s14, 0 }
  0x18   : > { %p369_p2 = scmp.lt.s32.totalorder %s2737_s30, 3  ;;  %s2739_s16 = smov [#allocation9]  }
  0x19   : > { %s381_s17 = sshll.u32 %s2739_s16, 4  ;;  %s2740_s19 = smov [#allocation10]   ;;  %s2869_s17 = int_to_ptr.vmem [resolvable:$true] %s381_s17 }
  0x1a   : > { %p2865_p3 = pnand %p2116_p0, %p369_p2  ;;  %s395_s20 = sshll.u32 %s2740_s19, 4  ;;  %s2880_s20 = int_to_ptr.vmem [resolvable:$true] %s395_s20 }
  0x1b   : > { %s2741_s21 = smov [#allocation13]   ;;  %s3429_s3 = sld [smem:[#allocation25_spill]] }
  0x1c   : > { %s3427_s15 = scalar_select %p2865_p3, 1, 0 }
  0x1d   : > { %p2309_p4 = pneg %p2865_p3  ;;  %s2882_s22 = sshll.u32 %s2741_s21, 4  ;;  %s420_s22 = int_to_ptr.vmem [resolvable:$true] %s2882_s22 }
  0x1f   : > { %p2876_p6 = pnand %p2309_p4, %p3411_p1 }
  0x21   : > { %s2439_s16 = scalar_lea.hbm %s3429_s3, 256  ;;  %p2892_p8 = pneg %p2876_p6 }
  0x22   : > { %p2440_p7 = scmp.ne.s32.totalorder %s3429_s3, %s2439_s16  ;;  %p2446_p11 = scmp.lt.u32.totalorder %s2439_s16, %s3429_s3 }
  0x24   : > { %p2442_p9 = pnand %p2892_p8, %p2440_p7 }
  0x26   : > { %p2443_p10 = pneg %p2442_p9 }
  0x28   : > { %p2448_p12 = pnand %p2446_p11, %p2443_p10 }
  0x2a   : > { %2451 = shalt.err (!%p2448_p12)
}
  0x2b   : > { %s2452_s12 = scalar_lea.vmem %s2869_s17, 256  ;;  %p2460_p4 = scmp.lt.s32.totalorder %s2869_s17, %s2869_s17 }
  0x2c   : > { %p2453_p13 = scmp.ne.s32.totalorder %s2869_s17, %s2452_s12  ;;  %p2461_p5 = scmp.lt.s32.totalorder %s2452_s12, %s2452_s12 }
  0x2e   : > { %p2455_p0 = pnand %p2453_p13, %p2892_p8  ;;  %p2462_p7 = por %p2461_p5, %p2460_p4 }
  0x30   : > { %p2456_p2 = pneg %p2455_p0 }
  0x32   : > { %p2463_p9 = pnand %p2462_p7, %p2456_p2 }
  0x34   : > { %2466 = shalt.err (!%p2463_p9)
}
  0x35   : > { %s2742_s13 = smov 64   ;;  %s2743_s23 = smov 4  }
  0x36   : > { %2312 = dma.hbm_to_vmem [thread:$0]  (!%p2876_p6), %s3429_s3, 256, %s2869_s17, [#allocation8], %s2742_s13, %s2742_s13, %s2743_s23  }
  0x37   : > { %s3431_s4 = sld [smem:[#allocation26_spill]] }
  0x3d   : > { %s2467_s12 = scalar_lea.hbm %s3431_s4, 16 }
  0x3e   : > { %p2468_p5 = scmp.ne.s32.totalorder %s3431_s4, %s2467_s12  ;;  %p2474_p12 = scmp.lt.u32.totalorder %s2467_s12, %s3431_s4 }
  0x40   : > { %p2470_p10 = pnand %p2468_p5, %p2892_p8 }
  0x42   : > { %p2471_p11 = pneg %p2470_p10 }
  0x44   : > { %p2476_p13 = pnand %p2474_p12, %p2471_p11 }
  0x46   : > { %2479 = shalt.err (!%p2476_p13)
}
  0x47   : > { %s2480_s17 = scalar_lea.vmem %s2880_s20, 16  ;;  %s2487_s9 = scalar_lea.vmem %s2880_s20, 32 }
  0x48   : > { %p2481_p0 = scmp.ne.s32.totalorder %s2880_s20, %s2480_s17  ;;  %p2488_p7 = scmp.lt.s32.totalorder %s2880_s20, %s2880_s20 }
  0x49   : > { %p2489_p9 = scmp.lt.s32.totalorder %s2487_s9, %s2480_s17 }
  0x4a   : > { %p2483_p2 = pnand %p2481_p0, %p2892_p8 }
  0x4b   : > { %p2490_p5 = por %p2489_p9, %p2488_p7 }
  0x4c   : > { %p2484_p4 = pneg %p2483_p2 }
  0x4e   : > { %p2491_p10 = pnand %p2490_p5, %p2484_p4 }
  0x50   : > { %2494 = shalt.err (!%p2491_p10)
}
  0x51   : > { %2315 = dma.hbm_to_vmem [thread:$0]  (!%p2876_p6), %s3431_s4, 16, %s2880_s20, [#allocation11]  }
  0x52   : > { %s3432_s7 = sld [smem:[#allocation28_spill]] }
  0x58   : > { %s2495_s16 = scalar_lea.hbm %s3432_s7, 256 }
  0x59   : > { %p2496_p11 = scmp.ne.s32.totalorder %s3432_s7, %s2495_s16  ;;  %p2502_p0 = scmp.lt.u32.totalorder %s2495_s16, %s3432_s7 }
  0x5b   : > { %p2498_p12 = pnand %p2496_p11, %p2892_p8 }
  0x5d   : > { %p2499_p13 = pneg %p2498_p12 }
  0x5f   : > { %p2504_p2 = pnand %p2502_p0, %p2499_p13 }
  0x61   : > { %2507 = shalt.err (!%p2504_p2)
}
  0x62   : > { %s2508_s9 = scalar_lea.vmem %s420_s22, 256  ;;  %p2516_p5 = scmp.lt.s32.totalorder %s420_s22, %s420_s22 }
  0x63   : > { %p2509_p4 = scmp.ne.s32.totalorder %s420_s22, %s2508_s9  ;;  %p2517_p10 = scmp.lt.s32.totalorder %s2508_s9, %s2508_s9 }
  0x65   : > { %p2511_p7 = pnand %p2509_p4, %p2892_p8  ;;  %p2518_p1 = por %p2517_p10, %p2516_p5 }
  0x67   : > { %p2512_p9 = pneg %p2511_p7 }
  0x69   : > { %p2519_p3 = pnand %p2518_p1, %p2512_p9 }
  0x6b   : > { %2522 = shalt.err (!%p2519_p3)
}
  0x6c   : > { %2321 = dma.hbm_to_vmem [thread:$0]  (!%p2876_p6), %s3432_s7, 256, %s420_s22, [#allocation14], %s2742_s13, %s2742_s13, %s2743_s23  }
  0x6d   : > { %s2744_s10 = smov [#allocation12]   ;;  %s2745_s24 = smov [#allocation15]  }
  0x6e   : > { %s409_s28 = sshll.u32 %s2744_s10, 4  ;;  %s433_s16 = sshll.u32 %s2745_s24, 4  ;;  %s410_s28 = int_to_ptr.vmem [resolvable:$true] %s409_s28  ;;  %s434_s16 = int_to_ptr.vmem [resolvable:$true] %s433_s16 }
  0x6f   : > { %s3433_s6 = sld [smem:[#allocation27_spill]] }
  0x75   : > { %s2523_s12 = scalar_lea.hbm %s3433_s6, 16 }
  0x76   : > { %p2524_p1 = scmp.ne.s32.totalorder %s3433_s6, %s2523_s12  ;;  %p2530_p12 = scmp.lt.u32.totalorder %s2523_s12, %s3433_s6 }
  0x78   : > { %p2526_p3 = pnand %p2524_p1, %p2892_p8 }
  0x7a   : > { %p2527_p11 = pneg %p2526_p3 }
  0x7c   : > { %p2532_p13 = pnand %p2530_p12, %p2527_p11 }
  0x7e   : > { %2535 = shalt.err (!%p2532_p13)
}
  0x7f   : > { %s2536_s22 = scalar_lea.vmem %s410_s28, 16  ;;  %s2543_s13 = scalar_lea.vmem %s410_s28, 32 }
  0x80   : > { %p2537_p0 = scmp.ne.s32.totalorder %s410_s28, %s2536_s22  ;;  %p2544_p7 = scmp.lt.s32.totalorder %s410_s28, %s410_s28 }
  0x81   : > { %p2545_p9 = scmp.lt.s32.totalorder %s2543_s13, %s2536_s22 }
  0x82   : > { %p2539_p2 = pnand %p2537_p0, %p2892_p8 }
  0x83   : > { %p2546_p5 = por %p2545_p9, %p2544_p7 }
  0x84   : > { %p2540_p4 = pneg %p2539_p2 }
  0x86   : > { %p2547_p10 = pnand %p2546_p5, %p2540_p4 }
  0x88   : > { %2550 = shalt.err (!%p2547_p10)
}
  0x89   : > { %2318 = dma.hbm_to_vmem [thread:$0]  (!%p2876_p6), %s3433_s6, 16, %s410_s28, [#allocation11]  }
  0x8a   : > { %s3434_s8 = sld [smem:[#allocation29_spill]] }
  0x90   : > { %s2551_s24 = scalar_lea.hbm %s3434_s8, 16 }
  0x91   : > { %p2552_p1 = scmp.ne.s32.totalorder %s3434_s8, %s2551_s24  ;;  %p2558_p12 = scmp.lt.u32.totalorder %s2551_s24, %s3434_s8 }
  0x93   : > { %p2554_p3 = pnand %p2552_p1, %p2892_p8 }
  0x95   : > { %p2555_p11 = pneg %p2554_p3 }
  0x97   : > { %p2560_p13 = pnand %p2558_p12, %p2555_p11 }
  0x99   : > { %2563 = shalt.err (!%p2560_p13)
}
  0x9a   : > { %s2564_s9 = scalar_lea.vmem %s434_s16, 16  ;;  %s2571_s28 = scalar_lea.vmem %s434_s16, 32 }
  0x9b   : > { %p2565_p0 = scmp.ne.s32.totalorder %s434_s16, %s2564_s9  ;;  %p2572_p7 = scmp.lt.s32.totalorder %s434_s16, %s434_s16 }
  0x9c   : > { %p2573_p9 = scmp.lt.s32.totalorder %s2571_s28, %s2564_s9 }
  0x9d   : > { %p2567_p2 = pnand %p2565_p0, %p2892_p8 }
  0x9e   : > { %p2574_p5 = por %p2573_p9, %p2572_p7 }
  0x9f   : > { %p2568_p4 = pneg %p2567_p2 }
  0xa1   : > { %p2575_p10 = pnand %p2574_p5, %p2568_p4 }
  0xa3   : > { %2578 = shalt.err (!%p2575_p10)
}
  0xa4   : > { %2324 = dma.hbm_to_vmem [thread:$0]  (!%p2876_p6), %s3434_s8, 16, %s434_s16, [#allocation14]  }
  0xa5   : > { %s2115_s11 = sadd.s32 4294967294, %s2737_s30   ;;  %s46_s13 = sadd.s32 1, %s2733_s29 }
  0xa6   : > { %s53_s18 = sadd.s32 1, %s2725_s27  ;;  %p48_p8 = scmp.ge.s32.totalorder %s46_s13, 2 }
  0xa7   : > { %p60_p1 = scmp.ne.s32.totalorder %s2725_s27, %s2721_s26  ;;  %p61_p3 = scmp.eq.s32.totalorder %s2737_s30, 0 }
  0xa8   : > { %p66_p11 = scmp.ne.s32.totalorder %s2721_s26, %s2717_s25  ;;  %s3465_s13 = smov (%p48_p8, %s46_s13), 0 }
  0xa9   : > { %p3008_p12 = por %p61_p3, %p60_p1  ;;  %p3436_p13 = scmp.eq.s32.totalorder %s2860_s14, 0 }
  0xaa   : > { %s50_s2 = ssub.s32 %s2733_s29, %s3465_s13  ;;  %p356_p0 = scmp.eq.s32.totalorder %s2860_s14, 1 }
  0xab   : > { %p3014_p6 = por %p3436_p13, %p66_p11  ;;  %p51_p2 = scmp.eq.s32.totalorder %s50_s2, 0 }
  0xac   : > { %p362_p4 = scmp.eq.s32.totalorder %s2115_s11, 1  ;;  %p3021_p7 = por %p356_p0, %p60_p1 }
  0xad   : > { %s3437_s16 = scalar_select %p3014_p6, 1, 0 }
  0xae   : > { %s3438_s3 = scalar_select %p3021_p7, 1, 0 }
  0xaf   : > { %p2341_p9 = scmp.lt.s32.totalorder %s2737_s30, 2  ;;  %p3029_p5 = por %p362_p4, %p66_p11 }
  0xb0   : > { %s3027_s10 = scalar_select %p51_p2, %s2725_s27, %s53_s18  }
  0xb1   : > { %s3439_s24 = scalar_select %p3029_p5, 1, 0 }
  0xb2   : > { %s456_s19 = sand.u32 1, %s2725_s27   ;;  %s2124_s12 = sshll.u32 %s2733_s29, 7 }
  0xb3   : > { %s3034_s21 = sshll.u32 %s456_s19, 3  ;;  %s3040_s28 = scalar_lea.hbm %s3394_s0, %s2124_s12 }
  0xb4   : > { %s460_s20 = scalar_lea.vmem [#allocation4], %s3034_s21  ;;  %p3047_p10 = pnand %p2341_p9, %p3008_p12 }
  0xb5   : > { %s467_s22 = sshll.u32 %s460_s20, 4  ;;  %s3054_s17 = scalar_lea.hbm %s3395_s1, %s2124_s12  ;;  %s3043_s22 = int_to_ptr.vmem [resolvable:$true] %s467_s22 }
  0xb6   : > { %s474_s9 = sand.u32 1, %s2737_s30   ;;  %s457_s4 = scalar_lea.sflag [#allocation5], %s456_s19 }
  0xb7   : > { %s2579_s6 = scalar_lea.hbm %s3040_s28, 128  ;;  %p2581_p1 = pneg %p3047_p10 }
  0xb8   : > { %p2580_p8 = scmp.ne.s32.totalorder %s3040_s28, %s2579_s6  ;;  %s2584_s7 = scalar_lea.hbm %s3394_s0, 256 }
  0xb9   : > { %p2585_p12 = scmp.lt.u32.totalorder %s3040_s28, %s3394_s0  ;;  %p2586_p13 = scmp.lt.u32.totalorder %s2584_s7, %s2579_s6 }
  0xba   : > { %p2582_p3 = pnand %p2581_p1, %p2580_p8  ;;  %p2588_p2 = scmp.lt.u32.totalorder %s2579_s6, %s3040_s28 }
  0xbb   : > { %p2587_p0 = por %p2586_p13, %p2585_p12 }
  0xbc   : > { %p2583_p11 = pneg %p2582_p3 }
  0xbd   : > { %p2589_p4 = por %p2588_p2, %p2587_p0 }
  0xbf   : > { %p2590_p9 = pnand %p2589_p4, %p2583_p11 }
  0xc1   : > { %2593 = shalt.err (!%p2590_p9)
}
  0xc2   : > { %s2594_s19 = scalar_lea.vmem %s3043_s22, 128  ;;  %s2746_s12 = smov [#allocation4]  }
  0xc3   : > { %p2595_p8 = scmp.ne.s32.totalorder %s3043_s22, %s2594_s19  ;;  %s2599_s2 = sshll.u32 %s2746_s12, 4  ;;  %s2600_s2 = int_to_ptr.vmem [resolvable:$false] %s2599_s2 }
  0xc4   : > { %s2601_s8 = scalar_lea.vmem %s2600_s2, 256  ;;  %p2602_p7 = scmp.lt.s32.totalorder %s3043_s22, %s2600_s2 }
  0xc5   : > { %p2597_p3 = pnand %p2595_p8, %p2581_p1  ;;  %p2603_p12 = scmp.lt.s32.totalorder %s2601_s8, %s2594_s19 }
  0xc7   : > { %p2598_p5 = pneg %p2597_p3  ;;  %p2604_p13 = por %p2603_p12, %p2602_p7 }
  0xc9   : > { %p2605_p0 = pnand %p2604_p13, %p2598_p5 }
  0xcb   : > { %2608 = shalt.err (!%p2605_p0)
}
  0xcc   : > { %2328 = dma.hbm_to_vmem [thread:$0]  (!%p3047_p10), %s3040_s28, 128, %s3043_s22, %s457_s4  }
  0xcd   : > { %s478_s6 = scalar_lea.vmem [#allocation7], %s3034_s21  ;;  %s475_s23 = scalar_lea.sflag [#allocation8], %s474_s9 }
  0xce   : > { %s486_s7 = sshll.u32 %s478_s6, 4  ;;  %s2609_s20 = scalar_lea.hbm %s3054_s17, 128  ;;  %s487_s7 = int_to_ptr.vmem [resolvable:$true] %s486_s7 }
  0xcf   : > { %p2610_p7 = scmp.ne.s32.totalorder %s3054_s17, %s2609_s20  ;;  %s2614_s12 = scalar_lea.hbm %s3395_s1, 256 }
  0xd0   : > { %p2615_p2 = scmp.lt.u32.totalorder %s3054_s17, %s3395_s1  ;;  %p2616_p4 = scmp.lt.u32.totalorder %s2614_s12, %s2609_s20 }
  0xd1   : > { %p2612_p5 = pnand %p2610_p7, %p2581_p1  ;;  %p2618_p8 = scmp.lt.u32.totalorder %s2609_s20, %s3054_s17 }
  0xd2   : > { %p2617_p9 = por %p2616_p4, %p2615_p2 }
  0xd3   : > { %p2613_p11 = pneg %p2612_p5 }
  0xd4   : > { %p2619_p3 = por %p2618_p8, %p2617_p9 }
  0xd6   : > { %p2620_p12 = pnand %p2619_p3, %p2613_p11 }
  0xd8   : > { %2623 = shalt.err (!%p2620_p12)
}
  0xd9   : > { %s2624_s4 = scalar_lea.vmem %s487_s7, 128  ;;  %s2747_s21 = smov [#allocation7]  }
  0xda   : > { %p2625_p13 = scmp.ne.s32.totalorder %s487_s7, %s2624_s4  ;;  %s2629_s28 = sshll.u32 %s2747_s21, 4  ;;  %s2630_s28 = int_to_ptr.vmem [resolvable:$false] %s2629_s28 }
  0xdb   : > { %s2631_s22 = scalar_lea.vmem %s2630_s28, 256  ;;  %p2632_p5 = scmp.lt.s32.totalorder %s487_s7, %s2630_s28 }
  0xdc   : > { %p2627_p0 = pnand %p2625_p13, %p2581_p1  ;;  %p2633_p6 = scmp.lt.s32.totalorder %s2631_s22, %s2624_s4 }
  0xde   : > { %p2628_p7 = pneg %p2627_p0  ;;  %p2634_p2 = por %p2633_p6, %p2632_p5 }
  0xe0   : > { %p2635_p4 = pnand %p2634_p2, %p2628_p7 }
  0xe2   : > { %2638 = shalt.err (!%p2635_p4)
}
  0xe3   : > { %2331 = dma.hbm_to_vmem [thread:$0]  (!%p3047_p10), %s3054_s17, 128, %s487_s7, %s475_s23  }
  0xe4   : > { %p3441_p11 = scmp.ne.s32.totalorder %s3427_s15, 0 }
  0xe5   : > { %s3107_s9 = sand.u32 (!%p3441_p11), 1, %s2721_s26   ;;  %p3442_p6 = scmp.ne.s32.totalorder (!%p3441_p11), %s3437_s16, 0 }
  0xe6   : > { %501 = sbr.rel (%p3441_p11) target bundleno = 2067 (0x813), region = 72  ;;  %s3110_s6 = sshll.u32 (!%p3441_p11), %s3107_s9, 3 }
  0xe7   : > { %s504_s20 = scalar_lea.sflag (!%p3441_p11), [#allocation5], %s3107_s9  ;;  %s507_s18 = scalar_lea.vmem (!%p3441_p11), [#allocation4], %s3110_s6 }
  0xed   : > { %2692 = dma.done.wait (%p3442_p6), %s504_s20, 128  }
  0xee   : > { %2694 = vsyncadd (%p3442_p6), %s504_s20, 4294967168  ;;  %s512_s15 = sand.u32 1, %s2860_s14   ;;  %s516_s17 = scalar_lea.vmem [#allocation7], %s3110_s6 }
  0xef   : > { %s513_s11 = scalar_lea.sflag [#allocation8], %s512_s15 }
  0xf0   : > { %2696 = dma.done.wait (%p3442_p6), %s513_s11, 128  }
  0xf1   : > { %2698 = vsyncadd (%p3442_p6), %s513_s11, 4294967168  ;;  %p3443_p10 = scmp.eq.s32.totalorder %s2860_s14, 0 }
  0xf3   : > { %2700 = dma.done.wait (%p3443_p10), [#allocation8], 256   ;;  %p3444_p1 = pmov %p3443_p10 }
  0xf5   : > { %2702 = vsyncadd (%p3444_p1), [#allocation8], 4294967040  ;;  %p3445_p9 = pmov %p3444_p1 }
  0xf6   : > { %p3446_p8 = pmov %p3444_p1 }
  0xf7   : > { %2704 = dma.done.wait (%p3445_p9), [#allocation11], 32  }
  0xf8   : > { %2706 = vsyncadd (%p3446_p8), [#allocation11], 4294967264  ;;  %p3447_p3 = pmov %p3444_p1 }
  0xf9   : > { %p3448_p12 = pmov %p3444_p1 }
  0xfa   : > { %2708 = dma.done.wait (%p3447_p3), [#allocation14], 272  }
  0xfb   : > { %2710 = vsyncadd (%p3448_p12), [#allocation14], 4294967024  ;;  %v2748_v0 = vmov 0.0   ;;  %vm2749_vm0 = vmmov 0   ;;  %v2413_v1 = vld [vmem:[%s3399_s5] sm:$0xff]   ;;  %v2414_v2 = vld [vmem:[%s3399_s5 + $0x8] sm:$0xff]   ;;  %v742_v25 = vlaneseq }
  0xfc   : > { %2203 = vmatprep.subr.bf16.mxu0 %v2748_v0  ;;  %2207 = vmatprep.mubr.msk.bf16.mxu0 %vm2749_vm0, %v2748_v0  ;;  %v595_v3 = vld [vmem:[%s507_s18] sm:$0xff]  ;;  %vm620_vm1 = vcmask 261120   ;;  %v3153_v7 = vld [vmem:[%s516_s17] sm:$0xff]  ;;  %s2750_s14 = smov 104   ;;  %s2751_s12 = smov 120   ;;  %vm877_vm2 = vcmask 60416  }
  0xfd   : > { %2211 = vmatprep.subr.bf16.mxu1 %v2748_v0  ;;  %2215 = vmatprep.mubr.msk.bf16.mxu1 %vm2749_vm0, %v2748_v0  ;;  %v2415_v4 = vld [vmem:[#allocation9] sm:$0xff]   ;;  %v596_v5 = vpack.c.bf16 %v595_v3, %v595_v3  ;;  %v2416_v6 = vld [vmem:[#allocation9 + $0x8] sm:$0xff]   ;;  %v1038_v8 = vpack.c.bf16 %v3153_v7, %v3153_v7  ;;  %v2136_v9 = vld [vmem:[#allocation12] ss:$0 sm:$0xff]  ;;  %s2752_s2 = smov 112   ;;  %v743_v29 = vshrl.u32 %v742_v25, 7 }
  0xfe   : > { %2204 = vmatpush3.bf16.msra.mxu0 %v2413_v1  ;;  %v2148_v15 = vld [vmem:[#allocation10] ss:$0 sm:$0xff]  ;;  %v2417_v19 = vld [vmem:[#allocation13] sm:$0xff]   ;;  %v2418_v22 = vld [vmem:[#allocation13 + $0x8] sm:$0xff]   ;;  %v2753_v23 = vmov 1983009808  }
  0xff   : > { %2205 = vmatprep.subr.bf16.mxu0 %v2748_v0  ;;  %2212 = vmatpush3.bf16.msra.mxu1 %v2417_v19  ;;  %v740_v24 = vunpack.c.l.s4 %v2753_v23  ;;  %v2754_v26 = vmov 1934713408   ;;  %vm1266_vm3 = vcmask 64512   ;;  %s3449_s8 = sld [smem:[#allocation23_spill]]  ;;  %s3450_s22 = sld [smem:[#allocation24_spill]]  ;;  %vm1506_vm4 = vcmask 1043456  }
 0x100   : > { %2213 = vmatprep.subr.bf16.mxu1 %v2748_v0  ;;  %v772_v27 = vunpack.c.l.s4 %v2754_v26  ;;  %s3451_s11 = sld [smem:[#allocation30_spill]]  ;;  %s2755_s7 = smov 16   ;;  %vm1837_vm5 = vcmask 130048   ;;  %vm1839_vm6 = vcmask 195584  }
 0x101   : > { %v741_v28 = vunpack.c.0.s8 %v740_v24  ;;  %s2756_s23 = smov 8   ;;  %s2757_s19 = smov 24  }
 0x102   : > { %2206 = vmatpush3.bf16.msra.mxu0 %v2414_v2  ;;  %v773_v32 = vunpack.c.0.s8 %v772_v27  ;;  %s3453_s28 = sld [smem:[#allocation32_spill]]  ;;  %s3454_s18 = sld [smem:[#allocation33_spill]] }
 0x103   : > { %2219 = vmatprep.subr.bf16.mxu0 %v2748_v0  ;;  %2214 = vmatpush3.bf16.msra.mxu1 %v2418_v22  ;;  %v3173_v33 = vsub.s32 %v741_v28, %v743_v29  ;;  %s586_s17 = scalar_lea.vmem [#allocation16], %s3110_s6  ;;  %p3456_p7 = scmp.ne.s32.totalorder %s3438_s3, 0 }
 0x104   : > { %2227 = vmatprep.subr.bf16.mxu1 %v2748_v0  ;;  %v3175_v39 = vsub.s32 %v773_v32, %v743_v29  ;;  %s1955_s16 = sshll.u32 %s586_s17, 4  ;;  %s2758_s6 = smov [#allocation16]   ;;  %s3346_s16 = int_to_ptr.vmem [resolvable:$true] %s1955_s16 }
 0x105   : > { %2208 = vmatmul.mubr.msk.bf16.vlgmr.msra.gmra.mrb[0].mxu0 %vm620_vm1, %v596_v5  ;;  %p587_p13 = scmp.lt.s32.totalorder %s3449_s8, 1  ;;  %s2172_s15 = sshll.u32 %s3449_s8, 7 }
 0x106   : > { %2220 = vmatpush3.bf16.msra.mxu0 %v2415_v4  ;;  %2223 = vmatprep.mubr.msk.bf16.mxu0 %vm2749_vm0, %v2748_v0 }
 0x107   : > { %2221 = vmatprep.subr.bf16.mxu0 %v2748_v0  ;;  %2216 = vmatmul.mubr.msk.bf16.vlgmr.msra.gmra.mrb[0].mxu1 %vm620_vm1, %v596_v5  ;;  %s588_s4 = scalar_select %p587_p13, %s3449_s8, 1 }
 0x108   : > { %2229 = vmatprep.mubr.msk.bf16.mxu1 %vm2749_vm0, %v2748_v0  ;;  %s2643_s8 = sshll.u32 %s2758_s6, 4  ;;  %s2644_s8 = int_to_ptr.vmem [resolvable:$false] %s2643_s8 }
 0x109   : > { %s589_s20 = scalar_lea.vmem %s3450_s22, %s588_s4  ;;  %s2645_s4 = scalar_lea.vmem %s2644_s8, 256 }
 0x10a   : > { %2222 = vmatpush3.bf16.msra.mxu0 %v2416_v6  ;;  %p2646_p4 = scmp.lt.s32.totalorder %s3346_s16, %s2644_s8 }
 0x10b   : > { %2233 = vmatprep.subr.bf16.mxu0 %v2748_v0 }
 0x10d   : > { %2224 = vmatmul.mubr.msk.bf16.vlgmr.msra.gmra.mrb[4].mxu0 %vm620_vm1, %v1038_v8 }
 0x10e   : > { %2235 = vmatprep.mubr.msk.bf16.mxu0 %vm2749_vm0, %v2748_v0 }
 0x1d8   : > { %v658_v10 = vpop.f32.mrb[0].mxu0 }
 0x1d9   : > { %v659_v11 = vadd.f32 %v2136_v9, %v658_v10  ;;  %v2209_v12 = vpop.f32.mrb[1].mxu0 }
 0x1da   : > { %v661_v13 = vpop.f32.mrb[2].mxu0 }
 0x1db   : > { %734 = vrot.lane.b32.xlu1 %v659_v11, %s2750_s14  ;;  %728 = vrot.lane.b32.xlu0 %v659_v11, %s2751_s12  ;;  %v2210_v14 = vpop.f32.mrb[3].mxu0 }
 0x1df   : > { %731 = vrot.lane.b32.xlu0 %v659_v11, %s2752_s2 }
 0x1e0   : > { %v1100_v16 = vpop.f32.mrb[4].mxu0 }
 0x1e1   : > { %v1101_v17 = vadd.f32 %v2148_v15, %v1100_v16  ;;  %v2225_v18 = vpop.f32.mrb[5].mxu0 }
 0x1e2   : > { %v1103_v20 = vpop.f32.mrb[6].mxu0 }
 0x1e3   : > { %1110 = vrot.lane.b32.xlu0 %v1101_v17, %s2752_s2  ;;  %1107 = vrot.lane.b32.xlu1 %v1101_v17, %s2751_s12  ;;  %v2226_v21 = vpop.f32.mrb[7].mxu0 }
 0x1e7   : > { %1113 = vrot.lane.b32.xlu1 %v1101_v17, %s2750_s14 }
 0x24d   : > { %v735_v30 = vpop.permute.xlu1 %734  ;;  %v729_v31 = vpop.permute.xlu0 %728 }
 0x24e   : > { %v753_v34 = vcombine.low %v729_v31, %v735_v30  ;;  %v754_v35 = vcombine.high %v729_v31, %v735_v30 }
 0x250   : > { %v761_v40 = vrot.slane %v753_v34, %v3173_v33  ;;  %v768_v41 = vrot.slane %v754_v35, %v3173_v33 }
 0x251   : > { %v732_v36 = vpop.permute.xlu0 %731 }
 0x252   : > { %v737_v37 = vcombine.low %v659_v11, %v732_v36  ;;  %v738_v38 = vcombine.high %v659_v11, %v732_v36 }
 0x254   : > { %v745_v42 = vrot.slane %v737_v37, %v3173_v33  ;;  %v752_v43 = vrot.slane %v738_v38, %v3173_v33 }
 0x255   : > { %v1108_v44 = vpop.permute.xlu1 %1107  ;;  %v1111_v49 = vpop.permute.xlu0 %1110 }
 0x256   : > { %v769_v45 = vcombine.low %v745_v42, %v761_v40  ;;  %v770_v46 = vcombine.high %v745_v42, %v761_v40  ;;  %v785_v47 = vcombine.low %v752_v43, %v768_v41  ;;  %v786_v48 = vcombine.high %v752_v43, %v768_v41 }
 0x257   : > { %v1116_v54 = vcombine.low %v1101_v17, %v1111_v49  ;;  %v1117_v55 = vcombine.high %v1101_v17, %v1111_v49 }
 0x258   : > { %v777_v50 = vrot.slane %v769_v45, %v3175_v39  ;;  %v784_v51 = vrot.slane %v770_v46, %v3175_v39  ;;  %v793_v52 = vrot.slane %v785_v47, %v3175_v39  ;;  %v800_v53 = vrot.slane %v786_v48, %v3175_v39 }
 0x259   : > { %v1114_v56 = vpop.permute.xlu1 %1113  ;;  %v1124_v4 = vrot.slane %v1116_v54, %v3173_v33  ;;  %v1131_v5 = vrot.slane %v1117_v55, %v3173_v33 }
 0x25a   : > { %v805_v57 = vcombine.low %v777_v50, %v784_v51  ;;  %v2144_v58 = vcombine.high %v777_v50, %v784_v51  ;;  %v821_v59 = vcombine.low %v793_v52, %v800_v53  ;;  %v2145_v60 = vcombine.high %v793_v52, %v800_v53 }
 0x25b   : > { %v1132_v61 = vcombine.low %v1108_v44, %v1114_v56  ;;  %v1133_v62 = vcombine.high %v1108_v44, %v1114_v56 }
 0x25c   : > { %v812_v63 = vrot.slane %v805_v57, %v3173_v33  ;;  %v820_v1 = vrot.slane %v2144_v58, %v3173_v33  ;;  %v828_v2 = vrot.slane %v821_v59, %v3173_v33  ;;  %v836_v3 = vrot.slane %v2145_v60, %v3173_v33 }
 0x25d   : > { %v1140_v6 = vrot.slane %v1132_v61, %v3173_v33  ;;  %v1147_v8 = vrot.slane %v1133_v62, %v3173_v33 }
 0x25e   : > { %v837_v9 = vcombine.low %v812_v63, %v820_v1  ;;  %v838_v10 = vcombine.high %v812_v63, %v820_v1  ;;  %v853_v11 = vcombine.low %v828_v2, %v836_v3  ;;  %v854_v12 = vcombine.high %v828_v2, %v836_v3 }
 0x25f   : > { %v1148_v13 = vcombine.low %v1124_v4, %v1140_v6  ;;  %v1149_v14 = vcombine.high %v1124_v4, %v1140_v6  ;;  %v1164_v15 = vcombine.low %v1131_v5, %v1147_v8  ;;  %v1165_v16 = vcombine.high %v1131_v5, %v1147_v8  ;;  %v721_v4 = vpop.f32.mrb[0].mxu1 }
 0x260   : > { %v845_v17 = vrot.slane %v837_v9, %v3175_v39  ;;  %v852_v18 = vrot.slane %v838_v10, %v3175_v39  ;;  %v861_v19 = vrot.slane %v853_v11, %v3175_v39  ;;  %v868_v20 = vrot.slane %v854_v12, %v3175_v39  ;;  %v2217_v5 = vpop.f32.mrb[1].mxu1  ;;  %v2154_v9 = vld [vmem:[%s589_s20] ss:$0 sm:$0xff] }
 0x261   : > { %v1156_v21 = vrot.slane %v1148_v13, %v3175_v39  ;;  %v1163_v22 = vrot.slane %v1149_v14, %v3175_v39  ;;  %v1172_v23 = vrot.slane %v1164_v15, %v3175_v39  ;;  %v1179_v24 = vrot.slane %v1165_v16, %v3175_v39  ;;  %v724_v6 = vpop.f32.mrb[2].mxu1 }
 0x262   : > { %v869_v25 = vcombine.low %v845_v17, %v861_v19  ;;  %v870_v26 = vcombine.high %v845_v17, %v861_v19  ;;  %v871_v27 = vcombine.low %v852_v18, %v868_v20  ;;  %v872_v28 = vcombine.high %v852_v18, %v868_v20  ;;  %v2218_v8 = vpop.f32.mrb[3].mxu1 }
 0x263   : > { %v1184_v29 = vcombine.low %v1156_v21, %v1163_v22  ;;  %v2152_v30 = vcombine.high %v1156_v21, %v1163_v22  ;;  %v1200_v31 = vcombine.low %v1172_v23, %v1179_v24  ;;  %v2153_v32 = vcombine.high %v1172_v23, %v1179_v24 }
 0x264   : > { %v873_v34 = vpack.c.bf16 %v869_v25, %v869_v25  ;;  %v874_v35 = vpack.c.bf16 %v870_v26, %v870_v26  ;;  %v875_v36 = vpack.c.bf16 %v871_v27, %v871_v27  ;;  %v876_v37 = vpack.c.bf16 %v872_v28, %v872_v28 }
 0x265   : > { %v1191_v38 = vrot.slane %v1184_v29, %v3173_v33  ;;  %v1199_v40 = vrot.slane %v2152_v30, %v3173_v33  ;;  %v1207_v41 = vrot.slane %v1200_v31, %v3173_v33  ;;  %v1215_v42 = vrot.slane %v2153_v32, %v3173_v33 }
 0x266   : > { %878 = vst.msk [vmem:[#allocation2] sm:$0xf] %vm877_vm2, %v873_v34  ;;  %879 = vst.msk [vmem:[#allocation2 + $0x4] sm:$0xf] %vm877_vm2, %v874_v35  ;;  %v2140_v35 = vld [vmem:[#allocation15] ss:$0 sm:$0xff] }
 0x267   : > { %880 = vst.msk [vmem:[#allocation2 + $0x8] sm:$0xf] %vm877_vm2, %v875_v36  ;;  %881 = vst.msk [vmem:[#allocation2 + $0xc] sm:$0xf] %vm877_vm2, %v876_v37  ;;  %v1216_v43 = vcombine.low %v1191_v38, %v1199_v40  ;;  %v1232_v44 = vcombine.low %v1207_v41, %v1215_v42  ;;  %v1217_v51 = vcombine.high %v1191_v38, %v1199_v40 }
 0x268   : > { %v1233_v52 = vcombine.high %v1207_v41, %v1215_v42  ;;  %v722_v36 = vadd.f32 %v2140_v35, %v721_v4 }
 0x269   : > { %v1224_v45 = vrot.slane %v1216_v43, %v3175_v39  ;;  %v1240_v46 = vrot.slane %v1232_v44, %v3175_v39  ;;  %v1231_v59 = vrot.slane %v1217_v51, %v3175_v39 }
 0x26a   : > { %v1247_v60 = vrot.slane %v1233_v52, %v3175_v39 }
 0x26b   : > { %v1248_v53 = vcombine.low %v1224_v45, %v1240_v46  ;;  %v1249_v54 = vcombine.high %v1224_v45, %v1240_v46 }
 0x26c   : > { %v1250_v63 = vcombine.low %v1231_v59, %v1247_v60  ;;  %v1251_v1 = vcombine.high %v1231_v59, %v1247_v60 }
 0x26d   : > { %v1256_v47 = vld [vmem:[#allocation2] sm:$0xf]  ;;  %v1257_v48 = vld [vmem:[#allocation2 + $0x4] sm:$0xf]  ;;  %v1252_v57 = vpack.c.bf16 %v1248_v53, %v1248_v53  ;;  %v1253_v58 = vpack.c.bf16 %v1249_v54, %v1249_v54 }
 0x26e   : > { %v1271_v49 = vsel %vm1266_vm3, %v1256_v47, 0  ;;  %v1317_v50 = vsel %vm1266_vm3, %v1257_v48, 0  ;;  %v1258_v55 = vld [vmem:[#allocation2 + $0x8] sm:$0xf]  ;;  %v1259_v56 = vld [vmem:[#allocation2 + $0xc] sm:$0xf]  ;;  %v1254_v2 = vpack.c.bf16 %v1250_v63, %v1250_v63  ;;  %v1255_v3 = vpack.c.bf16 %v1251_v1, %v1251_v1 }
 0x26f   : > { %2228 = vmatpush3.bf16.xpose.msra.mxu1 %v1271_v49  ;;  %2234 = vmatpush3.bf16.xpose.msra.mxu0 %v1317_v50  ;;  %v1363_v61 = vsel %vm1266_vm3, %v1258_v55, 0  ;;  %v1409_v62 = vsel %vm1266_vm3, %v1259_v56, 0 }
 0x270   : > { %2239 = vmatprep.subr.bf16.mxu1 %v2748_v0  ;;  %2245 = vmatprep.subr.bf16.mxu0 %v2748_v0 }
 0x276   : > { %2230 = vmatmul.mubr.msk.bf16.vlgmr.msra.gmra.mrb[4].mxu1 %vm1266_vm3, %v1252_v57  ;;  %2236 = vmatmul.mubr.msk.bf16.vlgmr.msra.gmra.mrb[8].mxu0 %vm1266_vm3, %v1253_v58 }
 0x277   : > { %2240 = vmatpush3.bf16.xpose.msra.mxu1 %v1363_v61  ;;  %2246 = vmatpush3.bf16.xpose.msra.mxu0 %v1409_v62 }
 0x278   : > { %2241 = vmatprep.mubr.msk.bf16.mxu1 %vm2749_vm0, %v2748_v0  ;;  %2247 = vmatprep.mubr.msk.bf16.mxu0 %vm2749_vm0, %v2748_v0 }
 0x279   : > { %2251 = vmatprep.subr.bf16.mxu1 %v2748_v0  ;;  %2257 = vmatprep.subr.bf16.mxu0 %v2748_v0 }
 0x27e   : > { %2242 = vmatmul.mubr.msk.bf16.vlgmr.msra.gmra.mrb[8].mxu1 %vm1266_vm3, %v1254_v2  ;;  %2248 = vmatmul.mubr.msk.bf16.vlgmr.msra.gmra.mrb[12].mxu0 %vm1266_vm3, %v1255_v3 }
 0x27f   : > { %2253 = vmatprep.mubr.msk.bf16.mxu1 %vm2749_vm0, %v2748_v0  ;;  %2259 = vmatprep.mubr.msk.bf16.mxu0 %vm2749_vm0, %v2748_v0 }
 0x349   : > { %v1307_v10 = vpop.f32.mrb[4].mxu1  ;;  %v1353_v11 = vpop.f32.mrb[8].mxu0 }
 0x34a   : > { %v1308_v12 = vadd.f32 %v2154_v9, %v1307_v10  ;;  %v1354_v13 = vadd.f32 %v2154_v9, %v1353_v11  ;;  %v2231_v14 = vpop.f32.mrb[5].mxu1  ;;  %v2237_v15 = vpop.f32.mrb[9].mxu0 }
 0x34b   : > { %v1310_v16 = vpop.f32.mrb[6].mxu1  ;;  %v1356_v17 = vpop.f32.mrb[10].mxu0 }
 0x34c   : > { %v2232_v18 = vpop.f32.mrb[7].mxu1  ;;  %v2238_v19 = vpop.f32.mrb[11].mxu0  ;;  %v1451_v20 = vsel %vm1266_vm3, %v1308_v12, -inf  ;;  %v1454_v21 = vsel %vm1266_vm3, %v1354_v13, -inf }
 0x34d   : > { %1452 = vmax.xlane.f32.xlu0 %v1451_v20  ;;  %1455 = vmax.xlane.f32.xlu1 %v1454_v21 }
 0x351   : > { %v1399_v22 = vpop.f32.mrb[8].mxu1  ;;  %v1445_v23 = vpop.f32.mrb[12].mxu0 }
 0x352   : > { %v1400_v24 = vadd.f32 %v2154_v9, %v1399_v22  ;;  %v2243_v25 = vpop.f32.mrb[9].mxu1  ;;  %v2249_v26 = vpop.f32.mrb[13].mxu0  ;;  %v1446_v29 = vadd.f32 %v2154_v9, %v1445_v23 }
 0x353   : > { %v1402_v27 = vpop.f32.mrb[10].mxu1  ;;  %v1448_v28 = vpop.f32.mrb[14].mxu0 }
 0x354   : > { %v2244_v30 = vpop.f32.mrb[11].mxu1  ;;  %v2250_v31 = vpop.f32.mrb[15].mxu0  ;;  %v1457_v32 = vsel %vm1266_vm3, %v1400_v24, -inf  ;;  %v1460_v34 = vsel %vm1266_vm3, %v1446_v29, -inf }
 0x355   : > { %1458 = vmax.xlane.f32.xlu0 %v1457_v32 }
 0x359   : > { %1461 = vmax.xlane.f32.xlu0 %v1460_v34 }
 0x35e   : > { %883 = vrot.lane.b32.xlu1 %v722_v36, %s2751_s12  ;;  %s1941_s12 = scalar_lea.sflag [#allocation6], %s3107_s9 }
 0x362   : > { %889 = vrot.lane.b32.xlu1 %v722_v36, %s2750_s14 }
 0x36f   : > { %886 = vrot.lane.b32.xlu0 %v722_v36, %s2752_s2  ;;  %s3452_s2 = sld [smem:[#allocation31_spill]] }
 0x3da   : > { %v1453_v37 = vpop.xlane.xlu0 %1452  ;;  %v1456_v38 = vpop.xlane.xlu1 %1455 }
 0x3db   : > { %v1463_v40 = vsub.f32 %v1308_v12, %v1453_v37  ;;  %v1464_v41 = vsub.f32 %v1354_v13, %v1456_v38 }
 0x3dd   : > { %v1467_v42 = vmul.f32 1.442695, %v1463_v40  ;;  %v1469_v43 = vmul.f32 1.442695, %v1464_v41 }
 0x3de   : > { %v884_v44 = vpop.permute.xlu1 %883 }
 0x3df   : > { %2421 = vpow2.f32 %v1467_v42 }
 0x3e0   : > { %2423 = vpow2.f32 %v1469_v43 }
 0x3e2   : > { %v1459_v45 = vpop.xlane.xlu0 %1458  ;;  %v890_v48 = vpop.permute.xlu1 %889 }
 0x3e3   : > { %v1465_v46 = vsub.f32 %v1400_v24, %v1459_v45  ;;  %v908_v52 = vcombine.low %v884_v44, %v890_v48  ;;  %v909_v53 = vcombine.high %v884_v44, %v890_v48 }
 0x3e5   : > { %v1471_v47 = vmul.f32 1.442695, %v1465_v46  ;;  %v916_v61 = vrot.slane %v908_v52, %v3173_v33  ;;  %v923_v62 = vrot.slane %v909_v53, %v3173_v33 }
 0x3e6   : > { %v1462_v49 = vpop.xlane.xlu0 %1461 }
 0x3e7   : > { %2425 = vpow2.f32 %v1471_v47  ;;  %v1466_v50 = vsub.f32 %v1446_v29, %v1462_v49 }
 0x3e9   : > { %v3245_v51 = vpop.eup %2421  ;;  %v1473_v54 = vmul.f32 1.442695, %v1466_v50 }
 0x3ea   : > { %v3247_v55 = vpop.eup %2423  ;;  %v887_v56 = vpop.permute.xlu0 %886  ;;  %v1475_v57 = vsel %vm1266_vm3, %v3245_v51, 0.0 }
 0x3eb   : > { %2427 = vpow2.f32 %v1473_v54  ;;  %v892_v58 = vcombine.low %v722_v36, %v887_v56  ;;  %v893_v59 = vcombine.high %v722_v36, %v887_v56  ;;  %1476 = vadd.xlane.f32.xlu1 %v1475_v57  ;;  %v1478_v60 = vsel %vm1266_vm3, %v3247_v55, 0.0 }
 0x3ec   : > { %1479 = vadd.xlane.f32.xlu0 %v1478_v60 }
 0x3ed   : > { %v900_v63 = vrot.slane %v892_v58, %v3173_v33  ;;  %v907_v1 = vrot.slane %v893_v59, %v3173_v33 }
 0x3ef   : > { %v924_v2 = vcombine.low %v900_v63, %v916_v61  ;;  %v925_v3 = vcombine.high %v900_v63, %v916_v61  ;;  %v940_v4 = vcombine.low %v907_v1, %v923_v62  ;;  %v941_v5 = vcombine.high %v907_v1, %v923_v62 }
 0x3f1   : > { %v3257_v6 = vpop.eup %2425  ;;  %v932_v8 = vrot.slane %v924_v2, %v3175_v39  ;;  %v939_v9 = vrot.slane %v925_v3, %v3175_v39  ;;  %v948_v10 = vrot.slane %v940_v4, %v3175_v39  ;;  %v955_v11 = vrot.slane %v941_v5, %v3175_v39 }
 0x3f2   : > { %v1481_v12 = vsel %vm1266_vm3, %v3257_v6, 0.0 }
 0x3f3   : > { %v960_v13 = vcombine.low %v932_v8, %v939_v9  ;;  %v2146_v14 = vcombine.high %v932_v8, %v939_v9  ;;  %v976_v15 = vcombine.low %v948_v10, %v955_v11  ;;  %v2147_v16 = vcombine.high %v948_v10, %v955_v11  ;;  %1482 = vadd.xlane.f32.xlu0 %v1481_v12 }
 0x3f5   : > { %v3265_v17 = vpop.eup %2427  ;;  %v967_v18 = vrot.slane %v960_v13, %v3173_v33  ;;  %v975_v19 = vrot.slane %v2146_v14, %v3173_v33  ;;  %v983_v20 = vrot.slane %v976_v15, %v3173_v33  ;;  %v991_v21 = vrot.slane %v2147_v16, %v3173_v33 }
 0x3f6   : > { %v1484_v22 = vsel %vm1266_vm3, %v3265_v17, 0.0 }
 0x3f7   : > { %v992_v23 = vcombine.low %v967_v18, %v975_v19  ;;  %v993_v24 = vcombine.high %v967_v18, %v975_v19  ;;  %v1008_v25 = vcombine.low %v983_v20, %v991_v21  ;;  %v1009_v26 = vcombine.high %v983_v20, %v991_v21  ;;  %1485 = vadd.xlane.f32.xlu1 %v1484_v22 }
 0x3f9   : > { %v1000_v27 = vrot.slane %v992_v23, %v3175_v39  ;;  %v1007_v28 = vrot.slane %v993_v24, %v3175_v39  ;;  %v1016_v29 = vrot.slane %v1008_v25, %v3175_v39  ;;  %v1023_v30 = vrot.slane %v1009_v26, %v3175_v39 }
 0x3fb   : > { %v1024_v31 = vcombine.low %v1000_v27, %v1016_v29  ;;  %v1025_v32 = vcombine.high %v1000_v27, %v1016_v29  ;;  %v1026_v34 = vcombine.low %v1007_v28, %v1023_v30  ;;  %v1027_v35 = vcombine.high %v1007_v28, %v1023_v30 }
 0x3fd   : > { %v1028_v36 = vpack.c.bf16 %v1024_v31, %v1024_v31  ;;  %v1029_v37 = vpack.c.bf16 %v1025_v32, %v1025_v32  ;;  %v1030_v38 = vpack.c.bf16 %v1026_v34, %v1026_v34  ;;  %v1031_v40 = vpack.c.bf16 %v1027_v35, %v1027_v35  ;;  %v2419_v31 = vld [vmem:[%s3451_s11] sm:$0xff]  }
 0x3ff   : > { %1032 = vst.msk [vmem:[#allocation3] sm:$0xf] %vm877_vm2, %v1028_v36  ;;  %1033 = vst.msk [vmem:[#allocation3 + $0x4] sm:$0xf] %vm877_vm2, %v1029_v37 }
 0x400   : > { %1034 = vst.msk [vmem:[#allocation3 + $0x8] sm:$0xf] %vm877_vm2, %v1030_v38  ;;  %1035 = vst.msk [vmem:[#allocation3 + $0xc] sm:$0xf] %vm877_vm2, %v1031_v40 }
 0x406   : > { %v1499_v41 = vld [vmem:[#allocation3] sm:$0xf]  ;;  %v1500_v42 = vld [vmem:[#allocation3 + $0x4] sm:$0xf] }
 0x407   : > { %v1508_v43 = vsel %vm1506_vm4, %v1499_v41, 0  ;;  %v1554_v44 = vsel %vm1506_vm4, %v1500_v42, 0  ;;  %v1501_v54 = vld [vmem:[#allocation3 + $0x8] sm:$0xf]  ;;  %v1502_v57 = vld [vmem:[#allocation3 + $0xc] sm:$0xf] }
 0x408   : > { %2252 = vmatpush3.bf16.msra.mxu1 %v1508_v43  ;;  %2258 = vmatpush3.bf16.msra.mxu0 %v1554_v44  ;;  %v1600_v59 = vsel %vm1506_vm4, %v1501_v54, 0  ;;  %v1646_v60 = vsel %vm1506_vm4, %v1502_v57, 0  ;;  %v2420_v42 = vld [vmem:[%s3451_s11 + $0x8] sm:$0xff]  }
 0x409   : > { %2263 = vmatprep.subr.bf16.mxu1 %v2748_v0  ;;  %2269 = vmatprep.subr.bf16.mxu0 %v2748_v0 }
 0x478   : > { %v1477_v45 = vpop.xlane.xlu1 %1476 }
 0x479   : > { %2429 = vrcp.f32 %v1477_v45  ;;  %v1480_v46 = vpop.xlane.xlu0 %1479 }
 0x47a   : > { %2431 = vrcp.f32 %v1480_v46 }
 0x480   : > { %v1483_v47 = vpop.xlane.xlu0 %1482 }
 0x481   : > { %2433 = vrcp.f32 %v1483_v47 }
 0x483   : > { %v2430_v48 = vpop.eup %2429 }
 0x484   : > { %v2432_v49 = vpop.eup %2431  ;;  %v1491_v50 = vmul.f32 %v2430_v48, %v3245_v51  ;;  %v1486_v52 = vpop.xlane.xlu1 %1485 }
 0x485   : > { %v1492_v53 = vmul.f32 %v2432_v49, %v3247_v55  ;;  %2435 = vrcp.f32 %v1486_v52 }
 0x486   : > { %v1495_v56 = vpack.c.bf16 %v1491_v50, %v1491_v50 }
 0x487   : > { %v1496_v58 = vpack.c.bf16 %v1492_v53, %v1492_v53 }
 0x488   : > { %2254 = vmatmul.mubr.msk.bf16.vlgmr.msra.gmra.mrb[12].mxu1 %vm1266_vm3, %v1495_v56 }
 0x489   : > { %2260 = vmatmul.mubr.msk.bf16.vlgmr.msra.gmra.mrb[16].mxu0 %vm1266_vm3, %v1496_v58  ;;  %2264 = vmatpush3.bf16.msra.mxu1 %v1600_v59 }
 0x48a   : > { %2270 = vmatpush3.bf16.msra.mxu0 %v1646_v60  ;;  %2265 = vmatprep.mubr.msk.bf16.mxu1 %vm2749_vm0, %v2748_v0 }
 0x48b   : > { %v2434_v51 = vpop.eup %2433  ;;  %2271 = vmatprep.mubr.msk.bf16.mxu0 %vm2749_vm0, %v2748_v0  ;;  %2275 = vmatprep.subr.bf16.mxu1 %v2748_v0 }
 0x48c   : > { %v1493_v55 = vmul.f32 %v2434_v51, %v3257_v6 }
 0x48e   : > { %v1497_v61 = vpack.c.bf16 %v1493_v55, %v1493_v55 }
 0x48f   : > { %v2436_v62 = vpop.eup %2435 }
 0x490   : > { %v1494_v63 = vmul.f32 %v2436_v62, %v3265_v17  ;;  %2266 = vmatmul.mubr.msk.bf16.vlgmr.msra.gmra.mrb[16].mxu1 %vm1266_vm3, %v1497_v61 }
 0x491   : > { %2279 = vmatprep.mubr.msk.bf16.mxu1 %vm2749_vm0, %v2748_v0  ;;  %2276 = vmatpush3.bf16.msra.mxu1 %v2419_v31 }
 0x492   : > { %v1498_v1 = vpack.c.bf16 %v1494_v63, %v1494_v63  ;;  %2277 = vmatprep.subr.bf16.mxu1 %v2748_v0  ;;  %v2165_v63 = vld [vmem:[%s3452_s2] ss:$0 sm:$0xff]  ;;  %s2639_s2 = scalar_lea.vmem %s3346_s16, 128 }
 0x493   : > { %p2640_p0 = scmp.ne.s32.totalorder %s3346_s16, %s2639_s2  ;;  %p2647_p11 = scmp.lt.s32.totalorder %s2645_s4, %s2639_s2 }
 0x494   : > { %2272 = vmatmul.mubr.msk.bf16.vlgmr.msra.gmra.mrb[20].mxu0 %vm1266_vm3, %v1498_v1 }
 0x495   : > { %2278 = vmatpush3.bf16.msra.mxu1 %v2420_v42  ;;  %p2641_p5 = pnand %p2640_p0, %p3456_p7  ;;  %p2648_p6 = por %p2647_p11, %p2646_p4 }
 0x497   : > { %p2642_p2 = pneg %p2641_p5 }
 0x499   : > { %p2649_p10 = pnand %p2648_p6, %p2642_p2 }
 0x55b   : > { %v1544_v2 = vpop.f32.mrb[12].mxu1 }
 0x55c   : > { %v1590_v3 = vpop.f32.mrb[16].mxu0  ;;  %v2255_v4 = vpop.f32.mrb[13].mxu1 }
 0x55d   : > { %v2261_v5 = vpop.f32.mrb[17].mxu0  ;;  %v1547_v8 = vpop.f32.mrb[14].mxu1 }
 0x55e   : > { %v1593_v9 = vpop.f32.mrb[18].mxu0  ;;  %v2256_v10 = vpop.f32.mrb[15].mxu1 }
 0x55f   : > { %v2262_v6 = vpop.f32.mrb[19].mxu0 }
 0x563   : > { %v1636_v11 = vpop.f32.mrb[16].mxu1 }
 0x564   : > { %v1688_v12 = vcombine.low %v1544_v2, %v1636_v11  ;;  %v1689_v13 = vcombine.high %v1544_v2, %v1636_v11  ;;  %v2267_v14 = vpop.f32.mrb[17].mxu1 }
 0x565   : > { %v1639_v15 = vpop.f32.mrb[18].mxu1 }
 0x566   : > { %v2268_v16 = vpop.f32.mrb[19].mxu1  ;;  %v1696_v22 = vrot.slane %v1688_v12, %v3173_v33  ;;  %v1703_v23 = vrot.slane %v1689_v13, %v3173_v33 }
 0x567   : > { %v1682_v17 = vpop.f32.mrb[20].mxu0 }
 0x568   : > { %v1704_v18 = vcombine.low %v1590_v3, %v1682_v17  ;;  %v1705_v19 = vcombine.high %v1590_v3, %v1682_v17  ;;  %v2273_v20 = vpop.f32.mrb[21].mxu0 }
 0x569   : > { %v1685_v21 = vpop.f32.mrb[22].mxu0 }
 0x56a   : > { %v1712_v24 = vrot.slane %v1704_v18, %v3173_v33  ;;  %v1719_v25 = vrot.slane %v1705_v19, %v3173_v33  ;;  %v2274_v26 = vpop.f32.mrb[23].mxu0  ;;  %v2170_v19 = vld [vmem:[%s3454_s18] ss:$0 sm:$0xff] }
 0x56c   : > { %v1720_v27 = vcombine.low %v1696_v22, %v1712_v24  ;;  %v1721_v28 = vcombine.high %v1696_v22, %v1712_v24  ;;  %v1736_v29 = vcombine.low %v1703_v23, %v1719_v25  ;;  %v1737_v30 = vcombine.high %v1703_v23, %v1719_v25 }
 0x56e   : > { %v1728_v32 = vrot.slane %v1720_v27, %v3175_v39  ;;  %v1735_v34 = vrot.slane %v1721_v28, %v3175_v39  ;;  %v1744_v35 = vrot.slane %v1736_v29, %v3175_v39  ;;  %v1751_v36 = vrot.slane %v1737_v30, %v3175_v39 }
 0x570   : > { %v1756_v37 = vcombine.low %v1728_v32, %v1735_v34  ;;  %v2163_v38 = vcombine.high %v1728_v32, %v1735_v34  ;;  %v1772_v40 = vcombine.low %v1744_v35, %v1751_v36  ;;  %v2164_v41 = vcombine.high %v1744_v35, %v1751_v36 }
 0x572   : > { %v1763_v43 = vrot.slane %v1756_v37, %v3173_v33  ;;  %v1771_v44 = vrot.slane %v2163_v38, %v3173_v33  ;;  %v1779_v45 = vrot.slane %v1772_v40, %v3173_v33  ;;  %v1787_v46 = vrot.slane %v2164_v41, %v3173_v33 }
 0x574   : > { %v1789_v47 = vcombine.high %v1763_v43, %v1771_v44  ;;  %v1805_v48 = vcombine.high %v1779_v45, %v1787_v46  ;;  %v1788_v49 = vcombine.low %v1763_v43, %v1771_v44  ;;  %v1804_v50 = vcombine.low %v1779_v45, %v1787_v46 }
 0x576   : > { %v1803_v52 = vrot.slane %v1789_v47, %v3175_v39  ;;  %v1819_v0 = vrot.slane %v1805_v48, %v3175_v39  ;;  %v1796_v53 = vrot.slane %v1788_v49, %v3175_v39  ;;  %v1812_v54 = vrot.slane %v1804_v50, %v3175_v39 }
 0x578   : > { %v1822_v56 = vcombine.low %v1803_v52, %v1819_v0  ;;  %v1821_v57 = vcombine.high %v1796_v53, %v1812_v54  ;;  %v1823_v58 = vcombine.high %v1803_v52, %v1819_v0  ;;  %v1820_v59 = vcombine.low %v1796_v53, %v1812_v54 }
 0x57a   : > { %1829 = vrot.lane.b32.xlu1 %v1822_v56, %s2755_s7  ;;  %1825 = vrot.lane.b32.xlu0 %v1821_v57, %s2756_s23 }
 0x57e   : > { %1833 = vrot.lane.b32.xlu1 %v1823_v58, %s2757_s19  ;;  %s3455_s19 = sld [smem:[#allocation34_spill]] }
 0x584   : > { %s3344_s14 = scalar_lea.hbm %s3455_s19, %s2172_s15 }
 0x5ec   : > { %v1830_v33 = vpop.permute.xlu1 %1829  ;;  %v1826_v60 = vpop.permute.xlu0 %1825 }
 0x5ed   : > { %v1836_v51 = vsel %vm1266_vm3, %v1820_v59, %v1826_v60 }
 0x5ee   : > { %v1838_v61 = vsel %vm1837_vm5, %v1836_v51, %v1830_v33 }
 0x5f0   : > { %v1834_v55 = vpop.permute.xlu1 %1833 }
 0x5f1   : > { %v1840_v62 = vsel %vm1839_vm6, %v1838_v61, %v1834_v55 }
 0x5f2   : > { %v1841_v39 = vpack.c.bf16 %v1840_v62, %v1840_v62 }
 0x5f4   : > { %2280 = vmatmul.mubr.msk.bf16.vlgmr.msra.gmra.mrb[20].mxu1 %vm620_vm1, %v1841_v39 }
 0x6c7   : > { %v1902_v1 = vpop.f32.mrb[20].mxu1 }
 0x6c8   : > { %v1903_v2 = vadd.f32 %v2165_v63, %v1902_v1  ;;  %v2281_v3 = vpop.f32.mrb[21].mxu1 }
 0x6c9   : > { %v1905_v4 = vpop.f32.mrb[22].mxu1 }
 0x6ca   : > { %v2282_v5 = vpop.f32.mrb[23].mxu1  ;;  %v1908_v8 = vadd.f32 %v1903_v2, %v3153_v7  ;;  %v2169_v7 = vld [vmem:[%s3453_s28] ss:$0 sm:$0xff] }
 0x6cc   : > { %v1909_v9 = vsel %vm620_vm1, %v1908_v8, 0.0 }
 0x6cd   : > { %1910 = vadd.xlane.f32.xlu0 %v1909_v9 }
 0x75a   : > { %v1911_v10 = vpop.xlane.xlu0 %1910 }
 0x75b   : > { %v1913_v6 = vmul.f32 0.03125, %v1911_v10 }
 0x75d   : > { %v1914_v11 = vsub.f32 %v1908_v8, %v1913_v6 }
 0x75f   : > { %v1915_v12 = vmul.f32 %v1914_v11, %v1914_v11 }
 0x761   : > { %v1916_v13 = vsel %vm620_vm1, %v1915_v12, 0.0 }
 0x762   : > { %1917 = vadd.xlane.f32.xlu1 %v1916_v13 }
 0x7ef   : > { %v1918_v14 = vpop.xlane.xlu1 %1917 }
 0x7f0   : > { %v1919_v15 = vmul.f32 0.03125, %v1918_v14 }
 0x7f2   : > { %v1921_v16 = vadd.f32 1e-12, %v1919_v15 }
 0x7f4   : > { %2437 = vrsqrt.f32 %v1921_v16 }
 0x7fe   : > { %v2438_v17 = vpop.eup %2437 }
 0x7ff   : > { %v1923_v18 = vmul.f32 %v2438_v17, %v1914_v11 }
 0x801   : > { %v1930_v20 = vmul.f32 %v2169_v7, %v1923_v18 }
 0x803   : > { %v1938_v21 = vadd.f32 %v2170_v19, %v1930_v20 }
 0x805   : > { %1939 = vst.msk [vmem:[%s586_s17] sm:$0xff] %vm620_vm1, %v1938_v21 }
 0x806   : > { %2652 = shalt.err (!%p2649_p10)
}
 0x807   : > { %s2653_s9 = scalar_lea.hbm %s3344_s14, 128  ;;  %s2657_s22 = scalar_lea.hbm %s3455_s19, 256 }
 0x808   : > { %p2654_p1 = scmp.ne.s32.totalorder %s3344_s14, %s2653_s9  ;;  %p2658_p3 = scmp.lt.u32.totalorder %s3344_s14, %s3455_s19 }
 0x809   : > { %p2659_p12 = scmp.lt.u32.totalorder %s2657_s22, %s2653_s9  ;;  %p2661_p0 = scmp.lt.u32.totalorder %s2653_s9, %s3344_s14 }
 0x80a   : > { %p2655_p9 = pnand %p2654_p1, %p3456_p7 }
 0x80b   : > { %p2660_p13 = por %p2659_p12, %p2658_p3 }
 0x80c   : > { %p2656_p8 = pneg %p2655_p9 }
 0x80d   : > { %p2662_p5 = por %p2661_p0, %p2660_p13 }
 0x80f   : > { %p2663_p2 = pnand %p2662_p5, %p2656_p8 }
 0x811   : > { %2666 = shalt.err (!%p2663_p2)
}
 0x812   : > { %2307 = dma.vmem_to_hbm [thread:$0]  (%p3456_p7), %s3346_s16, 128, %s3344_s14, %s1941_s12  }
 0x813 PF: > { %s1967_s15 = sand.u32 1, %s2717_s25   ;;  %p3457_p4 = scmp.ne.s32.totalorder %s3439_s24, 0 }
 0x814   : > { %p3458_p11 = scmp.ge.s32.totalorder %s2737_s30, 2  ;;  %s1968_s17 = scalar_lea.sflag [#allocation6], %s1967_s15 }
 0x816   : > { %p2333_p6 = pnand %p3458_p11, %p3457_p4 }
 0x818   : > { %2712 = dma.done.wait (!%p2333_p6), %s1968_s17, 128  }
 0x819   : > { %2714 = vsyncadd (!%p2333_p6), %s1968_s17, 4294967168  ;;  %s34_s30 = sadd.s32 1, %s2737_s30   ;;  %s3459_s25 = smov %s2721_s26 }
 0x81a   : > { %p31_p10 = scmp.ge.s32.totalorder %s34_s30, 4   ;;  %s3460_s26 = smov %s2725_s27 }
 0x81b   : > { %s3461_s27 = smov %s3027_s10  ;;  %s3462_s28 = smov %s2733_s29 }
 0x81c   : > { %s3463_s29 = smov %s3465_s13  ;;  %33 = sbr.rel (!%p31_p10) target bundleno = 22 (0x16), region = 157 }
 0x823   :  { %1973 = vsyncpa [#allocation5], 1 }
 0x824   :  { %1975 = vsyncpa [#allocation5 + $0x1], 1 }
 0x825   :  { %1976 = vsyncpa [#allocation8], 1 }
 0x826   :  { %1978 = vsyncpa [#allocation8 + $0x1], 1 }
 0x827   :  { %1979 = vsyncpa [#allocation11], 1 }
 0x828   :  { %1980 = vsyncpa [#allocation14], 1 }
 0x829   :  { %1981 = vsyncpa [#allocation6], 1 }
 0x82a   :  { %1983 = vsyncpa [#allocation6 + $0x1], 1 }

</bundles_post_ra>
